<compile_context>
chip_gen: v5e
topology: v5e:2x2
jax: 0.10.0
libtpu: 0.0.40
codegen_flags: <defaults>
</compile_context>

<pallas_src>
import math
from functools import partial

import jax
import jax.numpy as jnp
from jax.experimental import pallas as pl
from jax.experimental.pallas import tpu as pltpu


# ----------------------------- Pallas kernels --------------------------------
def _agg_kernel(a_ref, m_ref, b_ref, o_ref, acc_ref, *, apply_relu):
    """One (row-tile, k-tile) step of  out = adj @ M (+ bias, optional ReLU)."""
    k = pl.program_id(1)

    @pl.when(k == 0)
    def _():
        acc_ref[...] = jnp.zeros_like(acc_ref)

    acc_ref[...] += jnp.dot(a_ref[...], m_ref[...],
                            preferred_element_type=jnp.float32)

    @pl.when(k == pl.num_programs(1) - 1)
    def _():
        out = acc_ref[...] + b_ref[...]
        if apply_relu:
            out = jnp.maximum(out, 0.0)
        o_ref[...] = out.astype(o_ref.dtype)


def _transform_kernel(m_ref, w_ref, b_ref, o_ref, *, apply_relu):
    """Row-tiled feature transform  out = M @ W (+ bias, optional ReLU)."""
    out = jnp.dot(m_ref[...], w_ref[...],
                  preferred_element_type=jnp.float32) + b_ref[...]
    if apply_relu:
        out = jnp.maximum(out, 0.0)
    o_ref[...] = out.astype(o_ref.dtype)


# ------------------------------ Pallas wrappers -------------------------------
def aggregate(adj, m, bias, *, apply_relu, out_dtype, tm, tk):
    """adj[N,N] @ m[N,C] + bias (optional ReLU).  N % tm == N % tk == 0, C % 128 == 0."""
    n = adj.shape[0]
    c = m.shape[1]
    kernel = partial(_agg_kernel, apply_relu=apply_relu)
    bytes_accessed = int(n * n * adj.dtype.itemsize + n * c * m.dtype.itemsize
                         + c * 4 + n * c * jnp.dtype(out_dtype).itemsize)
    return pl.pallas_call(
        kernel,
        out_shape=jax.ShapeDtypeStruct((n, c), out_dtype),
        grid_spec=pltpu.PrefetchScalarGridSpec(
            num_scalar_prefetch=0,
            grid=(n // tm, n // tk),
            in_specs=[
                pl.BlockSpec((tm, tk), lambda i, k: (i, k)),   # adj tile
                pl.BlockSpec((tk, c), lambda i, k: (k, 0)),    # M tile (k-strip)
                pl.BlockSpec((1, c), lambda i, k: (0, 0)),     # bias
            ],
            out_specs=pl.BlockSpec((tm, c), lambda i, k: (i, 0)),
            scratch_shapes=[pltpu.VMEM((tm, c), jnp.float32)],
        ),
        compiler_params=pltpu.CompilerParams(
            dimension_semantics=("parallel", "arbitrary"),
            vmem_limit_bytes=32 * 1024 * 1024,
        ),
        cost_estimate=pl.CostEstimate(flops=int(2 * n * n * c),
                                      transcendentals=0,
                                      bytes_accessed=bytes_accessed),
    )(adj, m, bias)


def transform(m, w, bias, *, apply_relu, out_dtype, tm):
    """m[N,Ci] @ w[Ci,Co] + bias (optional ReLU), row-tiled.  N % tm == 0."""
    n, ci = m.shape
    co = w.shape[1]
    kernel = partial(_transform_kernel, apply_relu=apply_relu)
    bytes_accessed = int(n * ci * m.dtype.itemsize + ci * co * w.dtype.itemsize
                         + co * 4 + n * co * jnp.dtype(out_dtype).itemsize)
    return pl.pallas_call(
        kernel,
        out_shape=jax.ShapeDtypeStruct((n, co), out_dtype),
        grid_spec=pltpu.PrefetchScalarGridSpec(
            num_scalar_prefetch=0,
            grid=(n // tm,),
            in_specs=[
                pl.BlockSpec((tm, ci), lambda i: (i, 0)),
                pl.BlockSpec((ci, co), lambda i: (0, 0)),
                pl.BlockSpec((1, co), lambda i: (0, 0)),
            ],
            out_specs=pl.BlockSpec((tm, co), lambda i: (i, 0)),
        ),
        compiler_params=pltpu.CompilerParams(
            dimension_semantics=("parallel",),
            vmem_limit_bytes=32 * 1024 * 1024,
        ),
        cost_estimate=pl.CostEstimate(flops=int(2 * n * ci * co),
                                      transcendentals=0,
                                      bytes_accessed=bytes_accessed),
    )(m, w, bias)


# ------------------------------ forward glue ----------------------------------
def _round_up(x, m):
    return (x + m - 1) // m * m


def _pad2d(a, rows, cols):
    return jnp.pad(a, ((0, rows - a.shape[0]), (0, cols - a.shape[1])))


def gcn_inference(x, adj, weights, *, tm=256, tk=512):
    """Matches GCNInference.forward: x = adj @ x @ W + b per layer, ReLU except last."""
    n, c0 = x.shape
    assert adj.shape == (n, n)

    n_pad = _round_up(n, math.lcm(tm, tk))
    c_pad = [_round_up(c0, 128)]
    for w, _ in weights:
        c_pad.append(_round_up(w.shape[1], 128))

    # Pad to lane-dense / tile-aligned shapes and cast the streamed operands to
    # bf16 (f32 accumulation happens inside the kernels).  Padded adj rows/cols
    # and padded channel columns are zero, so real rows/channels are exact
    # (up to bf16 rounding) and the padding is sliced off at the end.
    adj_p = _pad2d(adj, n_pad, n_pad).astype(jnp.bfloat16)
    h = _pad2d(x, n_pad, c_pad[0]).astype(jnp.bfloat16)

    num_layers = len(weights)
    for i, (w, b) in enumerate(weights):
        ci_p, co_p = c_pad[i], c_pad[i + 1]
        w_p = _pad2d(w, ci_p, co_p).astype(jnp.bfloat16)
        b_p = jnp.pad(b.astype(jnp.float32), (0, co_p - b.shape[0])).reshape(1, co_p)
        last = i == num_layers - 1
        relu = not last
        out_dtype = jnp.float32 if last else jnp.bfloat16

        if ci_p < co_p:
            # (adj @ h) @ W : run the N^2 matmul at the narrower width.
            ah = aggregate(adj_p, h, jnp.zeros((1, ci_p), jnp.float32),
                           apply_relu=False, out_dtype=jnp.bfloat16, tm=tm, tk=tk)
            h = transform(ah, w_p, b_p, apply_relu=relu, out_dtype=out_dtype, tm=tm)
        else:
            # adj @ (h @ W) : feature transform hoisted out of the tiled loop.
            hw = transform(h, w_p, jnp.zeros((1, co_p), jnp.float32),
                           apply_relu=False, out_dtype=jnp.bfloat16, tm=tm)
            h = aggregate(adj_p, hw, b_p, apply_relu=relu,
                          out_dtype=out_dtype, tm=tm, tk=tk)

    c_out = weights[-1][0].shape[1]
    return h[:n, :c_out]


# ---------------------------- test-data helpers --------------------------------
def build_norm_adj(edge_index, num_nodes):
    """Dense symmetric-normalized adjacency D^-1/2 (A + I) D^-1/2 (test input)."""
    src, dst = edge_index[0], edge_index[1]
    a = jnp.zeros((num_nodes, num_nodes), jnp.float32)
    a = a.at[dst, src].add(1.0)
    a = a + jnp.eye(num_nodes, dtype=jnp.float32)
    deg = a.sum(axis=1)
    d_inv_sqrt = jnp.where(deg > 0, 1.0 / jnp.sqrt(deg), 0.0)
    return d_inv_sqrt[:, None] * a * d_inv_sqrt[None, :]


def glorot(key, shape):
    fan_in, fan_out = shape
    limit = jnp.sqrt(6.0 / (fan_in + fan_out))
    return jax.random.uniform(key, shape, jnp.float32, -limit, limit)


# --------------------------------- main ----------------------------------------
if __name__ == "__main__":
    key = jax.random.PRNGKey(0)
    k_x, k_e, k_w = jax.random.split(key, 3)

    num_nodes = 64
    in_channels = 16
    hidden_channels = 32
    out_channels = 8
    num_edges = 256

    x = jax.random.normal(k_x, (num_nodes, in_channels), jnp.float32)
    edge_index = jax.random.randint(k_e, (2, num_edges), 0, num_nodes, jnp.int32)
    adj = build_norm_adj(edge_index, num_nodes)

    # weights list like the module: in -> hidden -> hidden -> out
    dims = [(in_channels, hidden_channels),
            (hidden_channels, hidden_channels),
            (hidden_channels, out_channels)]
    weights = []
    for d_in, d_out in dims:
        k_w, kw, kb = jax.random.split(k_w, 3)
        weights.append((glorot(kw, (d_in, d_out)),
                        0.1 * jax.random.normal(kb, (d_out,), jnp.float32)))

    out = jax.jit(gcn_inference)(x, adj, weights)
    jax.block_until_ready(out)

    # pure-f32 reference of the module forward (loose tol: adj/x/W are bf16 in-kernel)
    ref = x
    for j, (w, b) in enumerate(weights):
        ref = adj @ ref @ w + b
        if j < len(weights) - 1:
            ref = jnp.maximum(ref, 0.0)

    assert out.shape == (num_nodes, out_channels)
    err = float(jnp.max(jnp.abs(out - ref)))
    assert err < 1e-1, f"max abs err {err}"
    print("KERNEL_OK")
</pallas_src>

<mosaic_0001>
module attributes {stable_mosaic.version = 11 : i64} {
  func.func @_agg_kernel(%arg0: i32, %arg1: i32, %arg2: memref<256x512xbf16, #tpu.memory_space<vmem>>, %arg3: memref<512x128xbf16, #tpu.memory_space<vmem>>, %arg4: memref<1x128xf32, #tpu.memory_space<vmem>>, %arg5: memref<256x128xf32, #tpu.memory_space<vmem>>, %arg6: memref<256x128xf32, #tpu.memory_space<vmem>>) attributes {dimension_semantics = [#tpu.dimension_semantics<parallel>, #tpu.dimension_semantics<arbitrary>], iteration_bounds = array<i64: 2, 1>, scalar_prefetch = 0 : i64, scratch_operands = 1 : i64, tpu.core_type = #tpu.core_type<tc>, window_params = [{transform_indices = @transform_0, window_bounds = array<i64: 256, 512>}, {transform_indices = @transform_1, window_bounds = array<i64: 512, 128>}, {pipeline_mode = #tpu.pipeline_mode<synchronous>, transform_indices = @transform_2, window_bounds = array<i64: 1, 128>}, {transform_indices = @transform_3, window_bounds = array<i64: 256, 128>}]} {
    %c0_i32 = arith.constant 0 : i32
    %0 = arith.cmpi eq, %arg1, %c0_i32 : i32
    %1 = arith.extui %0 : i1 to i32
    %c0_i32_0 = arith.constant 0 : i32
    %2 = arith.cmpi ne, %1, %c0_i32_0 : i32
    scf.if %2 {
      %cst_10 = arith.constant 0.000000e+00 : f32
      %12 = vector.broadcast %cst_10 : f32 to vector<256x128xf32>
      %c0_11 = arith.constant 0 : index
      %c0_12 = arith.constant 0 : index
      %13 = vector.load %arg6[%c0_11, %c0_12] : memref<256x128xf32, #tpu.memory_space<vmem>>, vector<256x128xf32>
      tpu.vector_store %arg6[%c0_11, %c0_12], %12 {strides = array<i32>} : memref<256x128xf32, #tpu.memory_space<vmem>>, vector<256x128xf32>,
    } else {
    }
    %c0 = arith.constant 0 : index
    %c0_1 = arith.constant 0 : index
    %3 = vector.load %arg6[%c0, %c0_1] : memref<256x128xf32, #tpu.memory_space<vmem>>, vector<256x128xf32>
    %c0_2 = arith.constant 0 : index
    %c0_3 = arith.constant 0 : index
    %4 = vector.load %arg2[%c0_2, %c0_3] : memref<256x512xbf16, #tpu.memory_space<vmem>>, vector<256x512xbf16>
    %c0_4 = arith.constant 0 : index
    %c0_5 = arith.constant 0 : index
    %5 = vector.load %arg3[%c0_4, %c0_5] : memref<512x128xbf16, #tpu.memory_space<vmem>>, vector<512x128xbf16>
    %cst = arith.constant dense<0.000000e+00> : vector<256x128xf32>
    %6 = tpu.matmul %4, %5, %cst {dimension_numbers = #tpu.dot_dimension_numbers<[1], [0], [0], [1], [0, 0, 1, 1], [], []>} : vector<256x512xbf16>, vector<512x128xbf16>, vector<256x128xf32> -> vector<256x128xf32>
    %7 = arith.addf %3, %6 : vector<256x128xf32>
    %c0_6 = arith.constant 0 : index
    %c0_7 = arith.constant 0 : index
    %8 = vector.load %arg6[%c0_6, %c0_7] : memref<256x128xf32, #tpu.memory_space<vmem>>, vector<256x128xf32>
    tpu.vector_store %arg6[%c0_6, %c0_7], %7 {strides = array<i32>} : memref<256x128xf32, #tpu.memory_space<vmem>>, vector<256x128xf32>,
    %c0_i32_8 = arith.constant 0 : i32
    %9 = arith.cmpi eq, %arg1, %c0_i32_8 : i32
    %10 = arith.extui %9 : i1 to i32
    %c0_i32_9 = arith.constant 0 : i32
    %11 = arith.cmpi ne, %10, %c0_i32_9 : i32
    scf.if %11 {
      %c0_10 = arith.constant 0 : index
      %c0_11 = arith.constant 0 : index
      %12 = vector.load %arg6[%c0_10, %c0_11] : memref<256x128xf32, #tpu.memory_space<vmem>>, vector<256x128xf32>
      %c0_12 = arith.constant 0 : index
      %c0_13 = arith.constant 0 : index
      %13 = vector.load %arg4[%c0_12, %c0_13] : memref<1x128xf32, #tpu.memory_space<vmem>>, vector<1x128xf32>
      %14 = vector.broadcast %13 : vector<1x128xf32> to vector<256x128xf32>
      %15 = arith.addf %12, %14 : vector<256x128xf32>
      %c0_14 = arith.constant 0 : index
      %c0_15 = arith.constant 0 : index
      %16 = vector.load %arg5[%c0_14, %c0_15] : memref<256x128xf32, #tpu.memory_space<vmem>>, vector<256x128xf32>
      tpu.vector_store %arg5[%c0_14, %c0_15], %15 {strides = array<i32>} : memref<256x128xf32, #tpu.memory_space<vmem>>, vector<256x128xf32>,
    } else {
    }
    return
  }
  func.func @transform_0(%arg0: i32, %arg1: i32) -> (i32, i32) {
    %c0_i32 = arith.constant 0 : i32
    return %arg0, %arg1 : i32, i32
  }
  func.func @transform_1(%arg0: i32, %arg1: i32) -> (i32, i32) {
    %c0_i32 = arith.constant 0 : i32
    %c0_i32_0 = arith.constant 0 : i32
    return %arg1, %c0_i32 : i32, i32
  }
  func.func @transform_2(%arg0: i32, %arg1: i32) -> (i32, i32) {
    %c0_i32 = arith.constant 0 : i32
    %c0_i32_0 = arith.constant 0 : i32
    %c0_i32_1 = arith.constant 0 : i32
    return %c0_i32, %c0_i32_0 : i32, i32
  }
  func.func @transform_3(%arg0: i32, %arg1: i32) -> (i32, i32) {
    %c0_i32 = arith.constant 0 : i32
    %c0_i32_0 = arith.constant 0 : i32
    return %arg0, %c0_i32 : i32, i32
  }
}

module attributes {stable_mosaic.version = 11 : i64} {
  func.func @_transform_kernel(%arg0: i32, %arg1: memref<256x128xbf16, #tpu.memory_space<vmem>>, %arg2: memref<128x128xbf16, #tpu.memory_space<vmem>>, %arg3: memref<1x128xf32, #tpu.memory_space<vmem>>, %arg4: memref<256x128xbf16, #tpu.memory_space<vmem>>) attributes {dimension_semantics = [#tpu.dimension_semantics<parallel>], iteration_bounds = array<i64: 2>, scalar_prefetch = 0 : i64, scratch_operands = 0 : i64, tpu.core_type = #tpu.core_type<tc>, window_params = [{transform_indices = @transform_0, window_bounds = array<i64: 256, 128>}, {pipeline_mode = #tpu.pipeline_mode<synchronous>, transform_indices = @transform_1, window_bounds = array<i64: 128, 128>}, {pipeline_mode = #tpu.pipeline_mode<synchronous>, transform_indices = @transform_2, window_bounds = array<i64: 1, 128>}, {transform_indices = @transform_3, window_bounds = array<i64: 256, 128>}]} {
    %c0 = arith.constant 0 : index
    %c0_0 = arith.constant 0 : index
    %0 = vector.load %arg1[%c0, %c0_0] : memref<256x128xbf16, #tpu.memory_space<vmem>>, vector<256x128xbf16>
    %c0_1 = arith.constant 0 : index
    %c0_2 = arith.constant 0 : index
    %1 = vector.load %arg2[%c0_1, %c0_2] : memref<128x128xbf16, #tpu.memory_space<vmem>>, vector<128x128xbf16>
    %cst = arith.constant dense<0.000000e+00> : vector<256x128xf32>
    %2 = tpu.matmul %0, %1, %cst {dimension_numbers = #tpu.dot_dimension_numbers<[1], [0], [0], [1], [0, 0, 1, 1], [], []>} : vector<256x128xbf16>, vector<128x128xbf16>, vector<256x128xf32> -> vector<256x128xf32>
    %c0_3 = arith.constant 0 : index
    %c0_4 = arith.constant 0 : index
    %3 = vector.load %arg3[%c0_3, %c0_4] : memref<1x128xf32, #tpu.memory_space<vmem>>, vector<1x128xf32>
    %4 = vector.broadcast %3 : vector<1x128xf32> to vector<256x128xf32>
    %5 = arith.addf %2, %4 : vector<256x128xf32>
    %6 = arith.truncf %5 : vector<256x128xf32> to vector<256x128xbf16>
    %c0_5 = arith.constant 0 : index
    %c0_6 = arith.constant 0 : index
    %7 = vector.load %arg4[%c0_5, %c0_6] : memref<256x128xbf16, #tpu.memory_space<vmem>>, vector<256x128xbf16>
    tpu.vector_store %arg4[%c0_5, %c0_6], %6 {strides = array<i32>} : memref<256x128xbf16, #tpu.memory_space<vmem>>, vector<256x128xbf16>,
    return
  }
  func.func @transform_0(%arg0: i32) -> (i32, i32) {
    %c0_i32 = arith.constant 0 : i32
    %c0_i32_0 = arith.constant 0 : i32
    return %arg0, %c0_i32 : i32, i32
  }
  func.func @transform_1(%arg0: i32) -> (i32, i32) {
    %c0_i32 = arith.constant 0 : i32
    %c0_i32_0 = arith.constant 0 : i32
    %c0_i32_1 = arith.constant 0 : i32
    return %c0_i32, %c0_i32_0 : i32, i32
  }
  func.func @transform_2(%arg0: i32) -> (i32, i32) {
    %c0_i32 = arith.constant 0 : i32
    %c0_i32_0 = arith.constant 0 : i32
    %c0_i32_1 = arith.constant 0 : i32
    return %c0_i32, %c0_i32_0 : i32, i32
  }
  func.func @transform_3(%arg0: i32) -> (i32, i32) {
    %c0_i32 = arith.constant 0 : i32
    %c0_i32_0 = arith.constant 0 : i32
    return %arg0, %c0_i32 : i32, i32
  }
}

module attributes {stable_mosaic.version = 11 : i64} {
  func.func @_agg_kernel(%arg0: i32, %arg1: i32, %arg2: memref<256x512xbf16, #tpu.memory_space<vmem>>, %arg3: memref<512x128xbf16, #tpu.memory_space<vmem>>, %arg4: memref<1x128xf32, #tpu.memory_space<vmem>>, %arg5: memref<256x128xbf16, #tpu.memory_space<vmem>>, %arg6: memref<256x128xf32, #tpu.memory_space<vmem>>) attributes {dimension_semantics = [#tpu.dimension_semantics<parallel>, #tpu.dimension_semantics<arbitrary>], iteration_bounds = array<i64: 2, 1>, scalar_prefetch = 0 : i64, scratch_operands = 1 : i64, tpu.core_type = #tpu.core_type<tc>, window_params = [{transform_indices = @transform_0, window_bounds = array<i64: 256, 512>}, {transform_indices = @transform_1, window_bounds = array<i64: 512, 128>}, {pipeline_mode = #tpu.pipeline_mode<synchronous>, transform_indices = @transform_2, window_bounds = array<i64: 1, 128>}, {transform_indices = @transform_3, window_bounds = array<i64: 256, 128>}]} {
    %c0_i32 = arith.constant 0 : i32
    %0 = arith.cmpi eq, %arg1, %c0_i32 : i32
    %1 = arith.extui %0 : i1 to i32
    %c0_i32_0 = arith.constant 0 : i32
    %2 = arith.cmpi ne, %1, %c0_i32_0 : i32
    scf.if %2 {
      %cst_10 = arith.constant 0.000000e+00 : f32
      %12 = vector.broadcast %cst_10 : f32 to vector<256x128xf32>
      %c0_11 = arith.constant 0 : index
      %c0_12 = arith.constant 0 : index
      %13 = vector.load %arg6[%c0_11, %c0_12] : memref<256x128xf32, #tpu.memory_space<vmem>>, vector<256x128xf32>
      tpu.vector_store %arg6[%c0_11, %c0_12], %12 {strides = array<i32>} : memref<256x128xf32, #tpu.memory_space<vmem>>, vector<256x128xf32>,
    } else {
    }
    %c0 = arith.constant 0 : index
    %c0_1 = arith.constant 0 : index
    %3 = vector.load %arg6[%c0, %c0_1] : memref<256x128xf32, #tpu.memory_space<vmem>>, vector<256x128xf32>
    %c0_2 = arith.constant 0 : index
    %c0_3 = arith.constant 0 : index
    %4 = vector.load %arg2[%c0_2, %c0_3] : memref<256x512xbf16, #tpu.memory_space<vmem>>, vector<256x512xbf16>
    %c0_4 = arith.constant 0 : index
    %c0_5 = arith.constant 0 : index
    %5 = vector.load %arg3[%c0_4, %c0_5] : memref<512x128xbf16, #tpu.memory_space<vmem>>, vector<512x128xbf16>
    %cst = arith.constant dense<0.000000e+00> : vector<256x128xf32>
    %6 = tpu.matmul %4, %5, %cst {dimension_numbers = #tpu.dot_dimension_numbers<[1], [0], [0], [1], [0, 0, 1, 1], [], []>} : vector<256x512xbf16>, vector<512x128xbf16>, vector<256x128xf32> -> vector<256x128xf32>
    %7 = arith.addf %3, %6 : vector<256x128xf32>
    %c0_6 = arith.constant 0 : index
    %c0_7 = arith.constant 0 : index
    %8 = vector.load %arg6[%c0_6, %c0_7] : memref<256x128xf32, #tpu.memory_space<vmem>>, vector<256x128xf32>
    tpu.vector_store %arg6[%c0_6, %c0_7], %7 {strides = array<i32>} : memref<256x128xf32, #tpu.memory_space<vmem>>, vector<256x128xf32>,
    %c0_i32_8 = arith.constant 0 : i32
    %9 = arith.cmpi eq, %arg1, %c0_i32_8 : i32
    %10 = arith.extui %9 : i1 to i32
    %c0_i32_9 = arith.constant 0 : i32
    %11 = arith.cmpi ne, %10, %c0_i32_9 : i32
    scf.if %11 {
      %c0_10 = arith.constant 0 : index
      %c0_11 = arith.constant 0 : index
      %12 = vector.load %arg6[%c0_10, %c0_11] : memref<256x128xf32, #tpu.memory_space<vmem>>, vector<256x128xf32>
      %c0_12 = arith.constant 0 : index
      %c0_13 = arith.constant 0 : index
      %13 = vector.load %arg4[%c0_12, %c0_13] : memref<1x128xf32, #tpu.memory_space<vmem>>, vector<1x128xf32>
      %14 = vector.broadcast %13 : vector<1x128xf32> to vector<256x128xf32>
      %15 = arith.addf %12, %14 : vector<256x128xf32>
      %cst_14 = arith.constant 0.000000e+00 : f32
      %16 = vector.broadcast %cst_14 : f32 to vector<256x128xf32>
      %17 = arith.maximumf %15, %16 : vector<256x128xf32>
      %18 = arith.truncf %17 : vector<256x128xf32> to vector<256x128xbf16>
      %c0_15 = arith.constant 0 : index
      %c0_16 = arith.constant 0 : index
      %19 = vector.load %arg5[%c0_15, %c0_16] : memref<256x128xbf16, #tpu.memory_space<vmem>>, vector<256x128xbf16>
      tpu.vector_store %arg5[%c0_15, %c0_16], %18 {strides = array<i32>} : memref<256x128xbf16, #tpu.memory_space<vmem>>, vector<256x128xbf16>,
    } else {
    }
    return
  }
  func.func @transform_0(%arg0: i32, %arg1: i32) -> (i32, i32) {
    %c0_i32 = arith.constant 0 : i32
    return %arg0, %arg1 : i32, i32
  }
  func.func @transform_1(%arg0: i32, %arg1: i32) -> (i32, i32) {
    %c0_i32 = arith.constant 0 : i32
    %c0_i32_0 = arith.constant 0 : i32
    return %arg1, %c0_i32 : i32, i32
  }
  func.func @transform_2(%arg0: i32, %arg1: i32) -> (i32, i32) {
    %c0_i32 = arith.constant 0 : i32
    %c0_i32_0 = arith.constant 0 : i32
    %c0_i32_1 = arith.constant 0 : i32
    return %c0_i32, %c0_i32_0 : i32, i32
  }
  func.func @transform_3(%arg0: i32, %arg1: i32) -> (i32, i32) {
    %c0_i32 = arith.constant 0 : i32
    %c0_i32_0 = arith.constant 0 : i32
    return %arg0, %c0_i32 : i32, i32
  }
}

</mosaic_0001>

<bundles_post_ra>
// kernel: gcn_inference.6
= control target key start
LH: loop header
LB: loop body
LE: loop exit
PB: predicated region body
PF: predicated region fallthrough
CT: control target
= control target key end

     0   :  { %s866_s12 = smov 0   ;;  %s987_s0 = inlined_call_operand.vmem [shape: bf16[512,128], index: 0, kind: input, shape index: {}]   ;;  %s988_s1 = inlined_call_operand.vmem [shape: bf16[128,128], index: 1, kind: input, shape index: {}]   ;;  %s989_s2 = inlined_call_operand.vmem [shape: f32[1,128], index: 2, kind: input, shape index: {}]   ;;  %s990_s3 = inlined_call_operand.vmem [shape: bf16[512,128], index: 3, kind: output, shape index: {}]  }
   0x1 LB: > { %s579_s13 = sadd.s32 4294967295, %s844_s12   ;;  %p583_p0 = scmp.ge.s32.totalorder %s844_s12, 1  ;;  %s844_s12 = sphi %s866_s12, %s13_s12  }
   0x2   : > { %p138_p1 = scmp.lt.s32.totalorder %s844_s12, 3 }
   0x4   : > { %p139_p2 = pnand %p583_p0, %p138_p1 }
   0x5   : > { %s584_s22 = sshll.u32 (!%p139_p2), %s579_s13, 5 }
   0x6   : > { %142 = sbr.rel (%p139_p2) target bundleno = 238 (0xee), region = 32  ;;  %p163_p3 = scmp.lt.s32.totalorder (!%p139_p2), %s584_s22, 63 }
   0xb   : > { %v709_v0 = vld [vmem:[%s988_s1 + $0x38] sm:$0xff]  ;;  %v708_v1 = vld [vmem:[%s988_s1 + $0x30] sm:$0xff]  ;;  %v707_v2 = vld [vmem:[%s988_s1 + $0x28] sm:$0xff]  ;;  %s992_s22 = smov (!%p163_p3, %s584_s22), 63 }
   0xc   : > { %370 = vmatpush.bf16.msra.mxu0 %v709_v0  ;;  %805 = vmatpush.bf16.msra.mxu1 %v709_v0  ;;  %v706_v3 = vld [vmem:[%s988_s1 + $0x20] sm:$0xff]  ;;  %v705_v4 = vld [vmem:[%s988_s1 + $0x18] sm:$0xff]  ;;  %v704_v5 = vld [vmem:[%s988_s1 + $0x10] sm:$0xff]  ;;  %s585_s29 = sshll.u32 %s992_s22, 2 }
   0xd   : > { %806 = vmatpush.bf16.msra.mxu2 %v709_v0  ;;  %807 = vmatpush.bf16.msra.mxu3 %v709_v0  ;;  %v703_v6 = vld [vmem:[%s988_s1 + $0x8] sm:$0xff]  ;;  %v702_v7 = vld [vmem:[%s988_s1] sm:$0xff]  ;;  %s906_s7 = scalar_lea.vmem %s987_s0, %s585_s29  ;;  %s938_s13 = scalar_lea.vmem %s990_s3, %s585_s29 }
   0xe   : > { %v686_v8 = vld [vmem:[%s906_s7] sm:$0xff]  ;;  %v687_v12 = vld [vmem:[%s906_s7 + $0x8] sm:$0xff]  ;;  %v688_v16 = vld [vmem:[%s906_s7 + $0x10] sm:$0xff] }
   0xf   : > { %v690_v9 = vld [vmem:[%s906_s7 + $0x20] sm:$0xff]  ;;  %v691_v13 = vld [vmem:[%s906_s7 + $0x28] sm:$0xff]  ;;  %v692_v17 = vld [vmem:[%s906_s7 + $0x30] sm:$0xff] }
  0x10   : > { %371 = vmatpush.bf16.msra.mxu0 %v708_v1  ;;  %808 = vmatpush.bf16.msra.mxu1 %v708_v1  ;;  %v694_v10 = vld [vmem:[%s906_s7 + $0x40] sm:$0xff]  ;;  %v695_v14 = vld [vmem:[%s906_s7 + $0x48] sm:$0xff]  ;;  %v696_v18 = vld [vmem:[%s906_s7 + $0x50] sm:$0xff] }
  0x11   : > { %809 = vmatpush.bf16.msra.mxu2 %v708_v1  ;;  %810 = vmatpush.bf16.msra.mxu3 %v708_v1  ;;  %v698_v11 = vld [vmem:[%s906_s7 + $0x60] sm:$0xff]  ;;  %v699_v15 = vld [vmem:[%s906_s7 + $0x68] sm:$0xff]  ;;  %v700_v19 = vld [vmem:[%s906_s7 + $0x70] sm:$0xff] }
  0x12   : > { %v689_v20 = vld [vmem:[%s906_s7 + $0x18] sm:$0xff]  ;;  %v927_v26 = vld [vmem:[%s989_s2] ss:$0 sm:$0xff] }
  0x13   : > { %v693_v21 = vld [vmem:[%s906_s7 + $0x38] sm:$0xff] }
  0x14   : > { %372 = vmatpush.bf16.msra.mxu0 %v707_v2  ;;  %811 = vmatpush.bf16.msra.mxu1 %v707_v2  ;;  %v697_v22 = vld [vmem:[%s906_s7 + $0x58] sm:$0xff] }
  0x15   : > { %812 = vmatpush.bf16.msra.mxu2 %v707_v2  ;;  %813 = vmatpush.bf16.msra.mxu3 %v707_v2  ;;  %v701_v23 = vld [vmem:[%s906_s7 + $0x78] sm:$0xff] }
  0x18   : > { %373 = vmatpush.bf16.msra.mxu0 %v706_v3  ;;  %814 = vmatpush.bf16.msra.mxu1 %v706_v3 }
  0x19   : > { %815 = vmatpush.bf16.msra.mxu2 %v706_v3  ;;  %816 = vmatpush.bf16.msra.mxu3 %v706_v3 }
  0x1c   : > { %374 = vmatpush.bf16.msra.mxu0 %v705_v4  ;;  %817 = vmatpush.bf16.msra.mxu1 %v705_v4 }
  0x1d   : > { %818 = vmatpush.bf16.msra.mxu2 %v705_v4  ;;  %819 = vmatpush.bf16.msra.mxu3 %v705_v4 }
  0x20   : > { %375 = vmatpush.bf16.msra.mxu0 %v704_v5  ;;  %820 = vmatpush.bf16.msra.mxu1 %v704_v5 }
  0x21   : > { %821 = vmatpush.bf16.msra.mxu2 %v704_v5  ;;  %822 = vmatpush.bf16.msra.mxu3 %v704_v5 }
  0x24   : > { %376 = vmatpush.bf16.msra.mxu0 %v703_v6  ;;  %823 = vmatpush.bf16.msra.mxu1 %v703_v6 }
  0x25   : > { %824 = vmatpush.bf16.msra.mxu2 %v703_v6  ;;  %825 = vmatpush.bf16.msra.mxu3 %v703_v6 }
  0x28   : > { %377 = vmatpush.bf16.msra.mxu0 %v702_v7  ;;  %826 = vmatpush.bf16.msra.mxu1 %v702_v7 }
  0x29   : > { %827 = vmatpush.bf16.msra.mxu2 %v702_v7  ;;  %828 = vmatpush.bf16.msra.mxu3 %v702_v7 }
  0x2b   : > { %378 = vmatmul.bf16.vlgmr.msra.gmra.mxu0 %v686_v8  ;;  %398 = vmatmul.bf16.vlgmr.msra.gmra.mxu1 %v690_v9 }
  0x2c   : > { %418 = vmatmul.bf16.vlgmr.msra.gmra.mxu2 %v694_v10  ;;  %438 = vmatmul.bf16.vlgmr.msra.gmra.mxu3 %v698_v11 }
  0x3b   : > { %383 = vmatmul.bf16.gmra.mxu0 %v687_v12  ;;  %403 = vmatmul.bf16.gmra.mxu1 %v691_v13 }
  0x3c   : > { %423 = vmatmul.bf16.gmra.mxu2 %v695_v14  ;;  %443 = vmatmul.bf16.gmra.mxu3 %v699_v15 }
  0x4b   : > { %388 = vmatmul.bf16.gmra.mxu0 %v688_v16  ;;  %408 = vmatmul.bf16.gmra.mxu1 %v692_v17 }
  0x4c   : > { %428 = vmatmul.bf16.gmra.mxu2 %v696_v18  ;;  %448 = vmatmul.bf16.gmra.mxu3 %v700_v19 }
  0x5b   : > { %393 = vmatmul.bf16.gmra.mxu0 %v689_v20  ;;  %413 = vmatmul.bf16.gmra.mxu1 %v693_v21 }
  0x5c   : > { %433 = vmatmul.bf16.gmra.mxu2 %v697_v22  ;;  %453 = vmatmul.bf16.gmra.mxu3 %v701_v23 }
  0xa8   : > { %v379_v24 = vpop.f32.mrf.mxu0  ;;  %v399_v25 = vpop.f32.mrf.mxu1 }
  0xa9   : > { %v380_v31 = vadd.f32 %v927_v26, %v379_v24  ;;  %v400_v32 = vadd.f32 %v927_v26, %v399_v25 }
  0xaf   : > { %v419_v27 = vpop.f32.mrf.mxu2  ;;  %v439_v28 = vpop.f32.mrf.mxu3 }
  0xb0   : > { %v381_v29 = vpop.f32.mrf.mxu0  ;;  %v401_v30 = vpop.f32.mrf.mxu1  ;;  %v420_v39 = vadd.f32 %v927_v26, %v419_v27  ;;  %v440_v40 = vadd.f32 %v927_v26, %v439_v28 }
  0xb1   : > { %v382_v33 = vadd.f32 %v927_v26, %v381_v29  ;;  %v402_v34 = vadd.f32 %v927_v26, %v401_v30 }
  0xb3   : > { %v713_v35 = vpack.c.bf16 %v382_v33, %v380_v31  ;;  %v733_v36 = vpack.c.bf16 %v402_v34, %v400_v32 }
  0xb5   : > { %714 = vst [vmem:[%s938_s13] sm:$0xff] %v713_v35  }
  0xb6   : > { %793 = vst [vmem:[%s938_s13 + $0x20] sm:$0xff] %v733_v36  }
  0xb7   : > { %v421_v37 = vpop.f32.mrf.mxu2  ;;  %v441_v38 = vpop.f32.mrf.mxu3 }
  0xb8   : > { %v422_v41 = vadd.f32 %v927_v26, %v421_v37  ;;  %v442_v42 = vadd.f32 %v927_v26, %v441_v38  ;;  %v384_v43 = vpop.f32.mrf.mxu0  ;;  %v404_v44 = vpop.f32.mrf.mxu1 }
  0xb9   : > { %v385_v51 = vadd.f32 %v927_v26, %v384_v43  ;;  %v405_v52 = vadd.f32 %v927_v26, %v404_v44 }
  0xba   : > { %v753_v45 = vpack.c.bf16 %v422_v41, %v420_v39  ;;  %v773_v46 = vpack.c.bf16 %v442_v42, %v440_v40 }
  0xbc   : > { %797 = vst [vmem:[%s938_s13 + $0x40] sm:$0xff] %v753_v45  }
  0xbd   : > { %801 = vst [vmem:[%s938_s13 + $0x60] sm:$0xff] %v773_v46  }
  0xbf   : > { %v424_v47 = vpop.f32.mrf.mxu2  ;;  %v444_v48 = vpop.f32.mrf.mxu3 }
  0xc0   : > { %v386_v49 = vpop.f32.mrf.mxu0  ;;  %v406_v50 = vpop.f32.mrf.mxu1  ;;  %v425_v59 = vadd.f32 %v927_v26, %v424_v47  ;;  %v445_v60 = vadd.f32 %v927_v26, %v444_v48 }
  0xc1   : > { %v387_v53 = vadd.f32 %v927_v26, %v386_v49  ;;  %v407_v54 = vadd.f32 %v927_v26, %v406_v50 }
  0xc3   : > { %v718_v55 = vpack.c.bf16 %v387_v53, %v385_v51  ;;  %v738_v56 = vpack.c.bf16 %v407_v54, %v405_v52 }
  0xc5   : > { %790 = vst [vmem:[%s938_s13 + $0x8] sm:$0xff] %v718_v55  }
  0xc6   : > { %794 = vst [vmem:[%s938_s13 + $0x28] sm:$0xff] %v738_v56  }
  0xc7   : > { %v426_v57 = vpop.f32.mrf.mxu2  ;;  %v446_v58 = vpop.f32.mrf.mxu3 }
  0xc8   : > { %v427_v61 = vadd.f32 %v927_v26, %v426_v57  ;;  %v447_v62 = vadd.f32 %v927_v26, %v446_v58  ;;  %v389_v63 = vpop.f32.mrf.mxu0  ;;  %v409_v0 = vpop.f32.mrf.mxu1 }
  0xc9   : > { %v390_v7 = vadd.f32 %v927_v26, %v389_v63  ;;  %v410_v8 = vadd.f32 %v927_v26, %v409_v0 }
  0xca   : > { %v758_v1 = vpack.c.bf16 %v427_v61, %v425_v59  ;;  %v778_v2 = vpack.c.bf16 %v447_v62, %v445_v60 }
  0xcc   : > { %798 = vst [vmem:[%s938_s13 + $0x48] sm:$0xff] %v758_v1  }
  0xcd   : > { %802 = vst [vmem:[%s938_s13 + $0x68] sm:$0xff] %v778_v2  }
  0xcf   : > { %v429_v3 = vpop.f32.mrf.mxu2  ;;  %v449_v4 = vpop.f32.mrf.mxu3 }
  0xd0   : > { %v391_v5 = vpop.f32.mrf.mxu0  ;;  %v411_v6 = vpop.f32.mrf.mxu1  ;;  %v430_v15 = vadd.f32 %v927_v26, %v429_v3  ;;  %v450_v16 = vadd.f32 %v927_v26, %v449_v4 }
  0xd1   : > { %v392_v9 = vadd.f32 %v927_v26, %v391_v5  ;;  %v412_v10 = vadd.f32 %v927_v26, %v411_v6 }
  0xd3   : > { %v723_v11 = vpack.c.bf16 %v392_v9, %v390_v7  ;;  %v743_v12 = vpack.c.bf16 %v412_v10, %v410_v8 }
  0xd5   : > { %791 = vst [vmem:[%s938_s13 + $0x10] sm:$0xff] %v723_v11  }
  0xd6   : > { %795 = vst [vmem:[%s938_s13 + $0x30] sm:$0xff] %v743_v12  }
  0xd7   : > { %v431_v13 = vpop.f32.mrf.mxu2  ;;  %v451_v14 = vpop.f32.mrf.mxu3 }
  0xd8   : > { %v432_v17 = vadd.f32 %v927_v26, %v431_v13  ;;  %v452_v18 = vadd.f32 %v927_v26, %v451_v14  ;;  %v394_v19 = vpop.f32.mrf.mxu0  ;;  %v414_v20 = vpop.f32.mrf.mxu1 }
  0xd9   : > { %v395_v28 = vadd.f32 %v927_v26, %v394_v19  ;;  %v415_v29 = vadd.f32 %v927_v26, %v414_v20 }
  0xda   : > { %v763_v21 = vpack.c.bf16 %v432_v17, %v430_v15  ;;  %v783_v22 = vpack.c.bf16 %v452_v18, %v450_v16 }
  0xdc   : > { %799 = vst [vmem:[%s938_s13 + $0x50] sm:$0xff] %v763_v21  }
  0xdd   : > { %803 = vst [vmem:[%s938_s13 + $0x70] sm:$0xff] %v783_v22  }
  0xdf   : > { %v434_v23 = vpop.f32.mrf.mxu2  ;;  %v454_v24 = vpop.f32.mrf.mxu3 }
  0xe0   : > { %v396_v25 = vpop.f32.mrf.mxu0  ;;  %v416_v27 = vpop.f32.mrf.mxu1  ;;  %v435_v36 = vadd.f32 %v927_v26, %v434_v23  ;;  %v455_v37 = vadd.f32 %v927_v26, %v454_v24 }
  0xe1   : > { %v397_v30 = vadd.f32 %v927_v26, %v396_v25  ;;  %v417_v31 = vadd.f32 %v927_v26, %v416_v27 }
  0xe3   : > { %v728_v32 = vpack.c.bf16 %v397_v30, %v395_v28  ;;  %v748_v33 = vpack.c.bf16 %v417_v31, %v415_v29 }
  0xe5   : > { %792 = vst [vmem:[%s938_s13 + $0x18] sm:$0xff] %v728_v32  }
  0xe6   : > { %796 = vst [vmem:[%s938_s13 + $0x38] sm:$0xff] %v748_v33  }
  0xe7   : > { %v436_v34 = vpop.f32.mrf.mxu2  ;;  %v456_v35 = vpop.f32.mrf.mxu3 }
  0xe8   : > { %v437_v38 = vadd.f32 %v927_v26, %v436_v34  ;;  %v457_v39 = vadd.f32 %v927_v26, %v456_v35 }
  0xea   : > { %v768_v40 = vpack.c.bf16 %v437_v38, %v435_v36  ;;  %v788_v41 = vpack.c.bf16 %v457_v39, %v455_v37 }
  0xec   : > { %800 = vst [vmem:[%s938_s13 + $0x58] sm:$0xff] %v768_v40  }
  0xed   : > { %804 = vst [vmem:[%s938_s13 + $0x78] sm:$0xff] %v788_v41  }
  0xee PF: > { %s13_s12 = sadd.s32 1, %s844_s12  }
  0xef   : > { %p10_p4 = scmp.ge.s32.totalorder %s13_s12, 4  }
  0xf1   :  { %12 = sbr.rel (!%p10_p4) target bundleno = 1 (0x1), region = 62 }

// kernel: gcn_inference.11
= control target key start
LH: loop header
LB: loop body
LE: loop exit
PB: predicated region body
PF: predicated region fallthrough
CT: control target
= control target key end

     0   :  { %s2107_s12 = smov 0   ;;  %s2109_s13 = smov 0   ;;  %s2444_s0 = inlined_call_operand.vmem [shape: bf16[512,512], index: 0, kind: input, shape index: {}]   ;;  %s2445_s1 = inlined_call_operand.vmem [shape: bf16[512,128], index: 1, kind: input, shape index: {}]   ;;  %s2446_s2 = inlined_call_operand.vmem [shape: f32[1,128], index: 2, kind: input, shape index: {}]   ;;  %s2447_s3 = inlined_call_operand.vmem [shape: f32[512,128], index: 3, kind: output, shape index: {}]  }
   0x1   :  { %s2111_s14 = smov 0  }
   0x2 LB: > { %s25_s15 = sadd.s32 1, %s2081_s13  ;;  %p1549_p0 = scmp.ge.s32.totalorder %s2085_s14, 1  ;;  %s2085_s14 = sphi %s2111_s14, %s13_s14   ;;  %s2081_s13 = sphi %s2109_s13, %s2449_s13   ;;  %s2077_s12 = sphi %s2107_s12, %s2448_s12  }
   0x3   : > { %p27_p1 = scmp.ge.s32.totalorder %s25_s15, 2  ;;  %p169_p2 = scmp.lt.s32.totalorder %s2085_s14, 3 }
   0x5   : > { %s2451_s15 = smov (%p27_p1, %s25_s15), 0  ;;  %p170_p3 = pnand %p1549_p0, %p169_p2 }
   0x6   : > { %s1550_s17 = sshll.u32 (!%p170_p3), %s2077_s12, 5 }
   0x7   : > { %173 = sbr.rel (%p170_p3) target bundleno = 433 (0x1b1), region = 32  ;;  %p205_p4 = scmp.lt.s32.totalorder (!%p170_p3), %s1550_s17, 63 }
   0xc   : > { %v2013_v0 = vld [vmem:[%s2445_s1 + $0x38] sm:$0xff]  ;;  %v2012_v4 = vld [vmem:[%s2445_s1 + $0x30] sm:$0xff]  ;;  %v2011_v8 = vld [vmem:[%s2445_s1 + $0x28] sm:$0xff]  ;;  %s2453_s17 = smov (!%p205_p4, %s1550_s17), 63 }
   0xd   : > { %v2021_v1 = vld [vmem:[%s2445_s1 + $0x78] sm:$0xff]  ;;  %935 = vmatpush.bf16.msra.mxu0 %v2013_v0  ;;  %v2020_v5 = vld [vmem:[%s2445_s1 + $0x70] sm:$0xff]  ;;  %v2019_v9 = vld [vmem:[%s2445_s1 + $0x68] sm:$0xff]  ;;  %s1941_s19 = sshll.u32 %s2453_s17, 4  ;;  %s1554_s11 = sshll.u32 %s2453_s17, 3 }
   0xe   : > { %v2029_v2 = vld [vmem:[%s2445_s1 + $0xb8] sm:$0xff]  ;;  %1024 = vmatpush.bf16.msra.mxu1 %v2021_v1  ;;  %v2028_v6 = vld [vmem:[%s2445_s1 + $0xb0] sm:$0xff]  ;;  %v2027_v10 = vld [vmem:[%s2445_s1 + $0xa8] sm:$0xff]  ;;  %s2212_s12 = scalar_lea.vmem %s2444_s0, %s1941_s19  ;;  %s2313_s21 = scalar_lea.vmem %s2447_s3, %s1554_s11 }
   0xf   : > { %v2037_v3 = vld [vmem:[%s2445_s1 + $0xf8] sm:$0xff]  ;;  %1113 = vmatpush.bf16.msra.mxu2 %v2029_v2  ;;  %v2036_v7 = vld [vmem:[%s2445_s1 + $0xf0] sm:$0xff]  ;;  %v2035_v11 = vld [vmem:[%s2445_s1 + $0xe8] sm:$0xff] }
  0x10   : > { %1202 = vmatpush.bf16.msra.mxu3 %v2037_v3  ;;  %v2010_v12 = vld [vmem:[%s2445_s1 + $0x20] sm:$0xff]  ;;  %v2009_v16 = vld [vmem:[%s2445_s1 + $0x18] sm:$0xff]  ;;  %v2008_v20 = vld [vmem:[%s2445_s1 + $0x10] sm:$0xff] }
  0x11   : > { %936 = vmatpush.bf16.msra.mxu0 %v2012_v4  ;;  %v2018_v13 = vld [vmem:[%s2445_s1 + $0x60] sm:$0xff]  ;;  %v2017_v17 = vld [vmem:[%s2445_s1 + $0x58] sm:$0xff]  ;;  %v2016_v21 = vld [vmem:[%s2445_s1 + $0x50] sm:$0xff] }
  0x12   : > { %1025 = vmatpush.bf16.msra.mxu1 %v2020_v5  ;;  %v2026_v14 = vld [vmem:[%s2445_s1 + $0xa0] sm:$0xff]  ;;  %v2025_v18 = vld [vmem:[%s2445_s1 + $0x98] sm:$0xff]  ;;  %v2024_v22 = vld [vmem:[%s2445_s1 + $0x90] sm:$0xff] }
  0x13   : > { %1114 = vmatpush.bf16.msra.mxu2 %v2028_v6  ;;  %v2034_v15 = vld [vmem:[%s2445_s1 + $0xe0] sm:$0xff]  ;;  %v2033_v19 = vld [vmem:[%s2445_s1 + $0xd8] sm:$0xff]  ;;  %v2032_v23 = vld [vmem:[%s2445_s1 + $0xd0] sm:$0xff] }
  0x14   : > { %1203 = vmatpush.bf16.msra.mxu3 %v2036_v7  ;;  %v2007_v24 = vld [vmem:[%s2445_s1 + $0x8] sm:$0xff]  ;;  %v2006_v28 = vld [vmem:[%s2445_s1] sm:$0xff]  ;;  %v1944_v33 = vld [vmem:[%s2212_s12 + $0xc] sm:$0xf0] }
  0x15   : > { %937 = vmatpush.bf16.msra.mxu0 %v2011_v8  ;;  %v2015_v25 = vld [vmem:[%s2445_s1 + $0x48] sm:$0xff]  ;;  %v2014_v29 = vld [vmem:[%s2445_s1 + $0x40] sm:$0xff]  ;;  %v1559_v35 = vld [vmem:[%s2212_s12 + $0x10] sm:$0xf0] }
  0x16   : > { %1026 = vmatpush.bf16.msra.mxu1 %v2019_v9  ;;  %v2023_v26 = vld [vmem:[%s2445_s1 + $0x88] sm:$0xff]  ;;  %v2022_v30 = vld [vmem:[%s2445_s1 + $0x80] sm:$0xff]  ;;  %v1945_v37 = vld [vmem:[%s2212_s12 + $0x14] sm:$0xf0] }
  0x17   : > { %1115 = vmatpush.bf16.msra.mxu2 %v2027_v10  ;;  %v2031_v27 = vld [vmem:[%s2445_s1 + $0xc8] sm:$0xff]  ;;  %v2030_v31 = vld [vmem:[%s2445_s1 + $0xc0] sm:$0xff]  ;;  %v1567_v39 = vld [vmem:[%s2212_s12 + $0x18] sm:$0xf0] }
  0x18   : > { %1204 = vmatpush.bf16.msra.mxu3 %v2035_v11  ;;  %v1557_v32 = vld [vmem:[%s2212_s12] sm:$0xf]  ;;  %v1942_v34 = vld [vmem:[%s2212_s12 + $0x4] sm:$0xf]  ;;  %v1565_v36 = vld [vmem:[%s2212_s12 + $0x8] sm:$0xf] }
  0x19   : > { %938 = vmatpush.bf16.msra.mxu0 %v2010_v12  ;;  %v1943_v38 = vld [vmem:[%s2212_s12 + $0xc] sm:$0xf]  ;;  %v1558_v40 = vor.u32 %v1944_v33, %v1557_v32  ;;  %v1562_v41 = vor.u32 %v1942_v34, %v1559_v35  ;;  %v1566_v42 = vor.u32 %v1945_v37, %v1565_v36  ;;  %v1573_v44 = vld [vmem:[%s2212_s12 + $0x20] sm:$0xf]  ;;  %v1948_v45 = vld [vmem:[%s2212_s12 + $0x2c] sm:$0xf0] }
  0x1a   : > { %1027 = vmatpush.bf16.msra.mxu1 %v2018_v13  ;;  %v1570_v43 = vor.u32 %v1943_v38, %v1567_v39  ;;  %v1946_v46 = vld [vmem:[%s2212_s12 + $0x24] sm:$0xf]  ;;  %v1575_v47 = vld [vmem:[%s2212_s12 + $0x30] sm:$0xf0]  ;;  %v1581_v48 = vld [vmem:[%s2212_s12 + $0x28] sm:$0xf]  ;;  %v1574_v52 = vor.u32 %v1948_v45, %v1573_v44 }
  0x1b   : > { %1116 = vmatpush.bf16.msra.mxu2 %v2026_v14  ;;  %v1949_v49 = vld [vmem:[%s2212_s12 + $0x34] sm:$0xf0]  ;;  %v1947_v50 = vld [vmem:[%s2212_s12 + $0x2c] sm:$0xf]  ;;  %v1583_v51 = vld [vmem:[%s2212_s12 + $0x38] sm:$0xf0]  ;;  %v1578_v53 = vor.u32 %v1946_v46, %v1575_v47 }
  0x1c   : > { %1205 = vmatpush.bf16.msra.mxu3 %v2034_v15  ;;  %v1582_v54 = vor.u32 %v1949_v49, %v1581_v48  ;;  %v1586_v55 = vor.u32 %v1947_v50, %v1583_v51  ;;  %v1589_v56 = vld [vmem:[%s2212_s12 + $0x40] sm:$0xf]  ;;  %v1952_v57 = vld [vmem:[%s2212_s12 + $0x4c] sm:$0xf0]  ;;  %v1950_v58 = vld [vmem:[%s2212_s12 + $0x44] sm:$0xf] }
  0x1d   : > { %939 = vmatpush.bf16.msra.mxu0 %v2009_v16  ;;  %v1591_v59 = vld [vmem:[%s2212_s12 + $0x50] sm:$0xf0]  ;;  %v1597_v60 = vld [vmem:[%s2212_s12 + $0x48] sm:$0xf]  ;;  %v1953_v61 = vld [vmem:[%s2212_s12 + $0x54] sm:$0xf0]  ;;  %v1590_v0 = vor.u32 %v1952_v57, %v1589_v56 }
  0x1e   : > { %1028 = vmatpush.bf16.msra.mxu1 %v2017_v17  ;;  %v1951_v62 = vld [vmem:[%s2212_s12 + $0x4c] sm:$0xf]  ;;  %v1599_v63 = vld [vmem:[%s2212_s12 + $0x58] sm:$0xf0]  ;;  %v1594_v1 = vor.u32 %v1950_v58, %v1591_v59  ;;  %v1598_v2 = vor.u32 %v1953_v61, %v1597_v60  ;;  %v1605_v4 = vld [vmem:[%s2212_s12 + $0x60] sm:$0xf] }
  0x1f   : > { %1117 = vmatpush.bf16.msra.mxu2 %v2025_v18  ;;  %v1602_v3 = vor.u32 %v1951_v62, %v1599_v63  ;;  %v1956_v5 = vld [vmem:[%s2212_s12 + $0x6c] sm:$0xf0]  ;;  %v1954_v6 = vld [vmem:[%s2212_s12 + $0x64] sm:$0xf]  ;;  %v1607_v7 = vld [vmem:[%s2212_s12 + $0x70] sm:$0xf0] }
  0x20   : > { %1206 = vmatpush.bf16.msra.mxu3 %v2033_v19  ;;  %v1613_v8 = vld [vmem:[%s2212_s12 + $0x68] sm:$0xf]  ;;  %v1957_v9 = vld [vmem:[%s2212_s12 + $0x74] sm:$0xf0]  ;;  %v1955_v10 = vld [vmem:[%s2212_s12 + $0x6c] sm:$0xf]  ;;  %v1606_v12 = vor.u32 %v1956_v5, %v1605_v4  ;;  %v1610_v13 = vor.u32 %v1954_v6, %v1607_v7 }
  0x21   : > { %940 = vmatpush.bf16.msra.mxu0 %v2008_v20  ;;  %v1615_v11 = vld [vmem:[%s2212_s12 + $0x78] sm:$0xf0]  ;;  %v1614_v14 = vor.u32 %v1957_v9, %v1613_v8  ;;  %v1621_v16 = vld [vmem:[%s2212_s12 + $0x80] sm:$0xf]  ;;  %v1960_v17 = vld [vmem:[%s2212_s12 + $0x8c] sm:$0xf0] }
  0x22   : > { %1029 = vmatpush.bf16.msra.mxu1 %v2016_v21  ;;  %v1618_v15 = vor.u32 %v1955_v10, %v1615_v11  ;;  %v1958_v18 = vld [vmem:[%s2212_s12 + $0x84] sm:$0xf]  ;;  %v1623_v19 = vld [vmem:[%s2212_s12 + $0x90] sm:$0xf0]  ;;  %v1629_v20 = vld [vmem:[%s2212_s12 + $0x88] sm:$0xf] }
  0x23   : > { %1118 = vmatpush.bf16.msra.mxu2 %v2024_v22  ;;  %v1961_v21 = vld [vmem:[%s2212_s12 + $0x94] sm:$0xf0]  ;;  %v1959_v22 = vld [vmem:[%s2212_s12 + $0x8c] sm:$0xf]  ;;  %v1645_v32 = vld [vmem:[%s2212_s12 + $0xa8] sm:$0xf] }
  0x24   : > { %1207 = vmatpush.bf16.msra.mxu3 %v2032_v23  ;;  %v1631_v23 = vld [vmem:[%s2212_s12 + $0x98] sm:$0xf0]  ;;  %v1965_v33 = vld [vmem:[%s2212_s12 + $0xb4] sm:$0xf0]  ;;  %v1963_v34 = vld [vmem:[%s2212_s12 + $0xac] sm:$0xf] }
  0x25   : > { %941 = vmatpush.bf16.msra.mxu0 %v2007_v24  ;;  %v1622_v24 = vor.u32 %v1960_v17, %v1621_v16  ;;  %v1647_v35 = vld [vmem:[%s2212_s12 + $0xb8] sm:$0xf0]  ;;  %v1646_v38 = vor.u32 %v1965_v33, %v1645_v32  ;;  %v1661_v44 = vld [vmem:[%s2212_s12 + $0xc8] sm:$0xf]  ;;  %v1969_v45 = vld [vmem:[%s2212_s12 + $0xd4] sm:$0xf0] }
  0x26   : > { %1030 = vmatpush.bf16.msra.mxu1 %v2015_v25  ;;  %v1626_v25 = vor.u32 %v1958_v18, %v1623_v19  ;;  %v1650_v39 = vor.u32 %v1963_v34, %v1647_v35  ;;  %v1967_v46 = vld [vmem:[%s2212_s12 + $0xcc] sm:$0xf]  ;;  %v1663_v47 = vld [vmem:[%s2212_s12 + $0xd8] sm:$0xf0]  ;;  %v1662_v50 = vor.u32 %v1969_v45, %v1661_v44  ;;  %v1677_v56 = vld [vmem:[%s2212_s12 + $0xe8] sm:$0xf] }
  0x27   : > { %1119 = vmatpush.bf16.msra.mxu2 %v2023_v26  ;;  %v1630_v26 = vor.u32 %v1961_v21, %v1629_v20  ;;  %v1666_v51 = vor.u32 %v1967_v46, %v1663_v47  ;;  %v1973_v57 = vld [vmem:[%s2212_s12 + $0xf4] sm:$0xf0]  ;;  %v1971_v58 = vld [vmem:[%s2212_s12 + $0xec] sm:$0xf]  ;;  %v1679_v59 = vld [vmem:[%s2212_s12 + $0xf8] sm:$0xf0] }
  0x28   : > { %1208 = vmatpush.bf16.msra.mxu3 %v2031_v27  ;;  %v1634_v27 = vor.u32 %v1959_v22, %v1631_v23  ;;  %v1678_v62 = vor.u32 %v1973_v57, %v1677_v56  ;;  %v1682_v63 = vor.u32 %v1971_v58, %v1679_v59  ;;  %v1693_v4 = vld [vmem:[%s2212_s12 + $0x108] sm:$0xf]  ;;  %v1977_v5 = vld [vmem:[%s2212_s12 + $0x114] sm:$0xf0]  ;;  %v1975_v6 = vld [vmem:[%s2212_s12 + $0x10c] sm:$0xf] }
  0x29   : > { %942 = vmatpush.bf16.msra.mxu0 %v2006_v28  ;;  %v1637_v28 = vld [vmem:[%s2212_s12 + $0xa0] sm:$0xf]  ;;  %v1695_v7 = vld [vmem:[%s2212_s12 + $0x118] sm:$0xf0]  ;;  %v1980_v23 = vld [vmem:[%s2212_s12 + $0x12c] sm:$0xf0] }
  0x2a   : > { %1031 = vmatpush.bf16.msra.mxu1 %v2014_v29  ;;  %v1964_v29 = vld [vmem:[%s2212_s12 + $0xac] sm:$0xf0]  ;;  %v2308_v18 = vld [vmem:[%s2446_s2] ss:$0 sm:$0xff]  ;;  %v1985_v56 = vld [vmem:[%s2212_s12 + $0x154] sm:$0xf0] }
  0x2b   : > { %1120 = vmatpush.bf16.msra.mxu2 %v2022_v30  ;;  %v1962_v30 = vld [vmem:[%s2212_s12 + $0xa4] sm:$0xf]  ;;  %v1638_v36 = vor.u32 %v1964_v29, %v1637_v28  ;;  %v1701_v22 = vld [vmem:[%s2212_s12 + $0x120] sm:$0xf]  ;;  %v1981_v28 = vld [vmem:[%s2212_s12 + $0x134] sm:$0xf0] }
  0x2c   : > { %1209 = vmatpush.bf16.msra.mxu3 %v2030_v31  ;;  %943 = vmatmul.bf16.vlgmr.msra.gmra.mxu0 %v1558_v40  ;;  %v1639_v31 = vld [vmem:[%s2212_s12 + $0xb0] sm:$0xf0]  ;;  %v1653_v40 = vld [vmem:[%s2212_s12 + $0xc0] sm:$0xf]  ;;  %v1979_v29 = vld [vmem:[%s2212_s12 + $0x12c] sm:$0xf]  ;;  %v1702_v34 = vor.u32 %v1980_v23, %v1701_v22 }
  0x2d   : > { %1032 = vmatmul.bf16.vlgmr.msra.gmra.mxu1 %v1562_v41  ;;  %v1642_v37 = vor.u32 %v1962_v30, %v1639_v31  ;;  %v1968_v41 = vld [vmem:[%s2212_s12 + $0xcc] sm:$0xf0]  ;;  %v1711_v30 = vld [vmem:[%s2212_s12 + $0x138] sm:$0xf0]  ;;  %v1983_v57 = vld [vmem:[%s2212_s12 + $0x14c] sm:$0xf] }
  0x2e   : > { %1121 = vmatmul.bf16.vlgmr.msra.gmra.mxu2 %v1566_v42  ;;  %v1966_v42 = vld [vmem:[%s2212_s12 + $0xc4] sm:$0xf]  ;;  %v1654_v48 = vor.u32 %v1968_v41, %v1653_v40  ;;  %v1714_v40 = vor.u32 %v1979_v29, %v1711_v30  ;;  %v1727_v58 = vld [vmem:[%s2212_s12 + $0x158] sm:$0xf0]  ;;  %v1987_v22 = vld [vmem:[%s2212_s12 + $0x16c] sm:$0xf] }
  0x2f   : > { %1210 = vmatmul.bf16.vlgmr.msra.gmra.mxu3 %v1570_v43  ;;  %v1655_v43 = vld [vmem:[%s2212_s12 + $0xd0] sm:$0xf0]  ;;  %v1743_v23 = vld [vmem:[%s2212_s12 + $0x178] sm:$0xf0] }
  0x30   : > { %v1658_v49 = vor.u32 %v1966_v42, %v1655_v43 }
  0x3c   : > { %948 = vmatmul.bf16.gmra.mxu0 %v1574_v52  ;;  %v1669_v52 = vld [vmem:[%s2212_s12 + $0xe0] sm:$0xf] }
  0x3d   : > { %1037 = vmatmul.bf16.gmra.mxu1 %v1578_v53  ;;  %v1972_v53 = vld [vmem:[%s2212_s12 + $0xec] sm:$0xf0] }
  0x3e   : > { %1126 = vmatmul.bf16.gmra.mxu2 %v1582_v54  ;;  %v1970_v54 = vld [vmem:[%s2212_s12 + $0xe4] sm:$0xf]  ;;  %v1670_v60 = vor.u32 %v1972_v53, %v1669_v52 }
  0x3f   : > { %1215 = vmatmul.bf16.gmra.mxu3 %v1586_v55  ;;  %v1671_v55 = vld [vmem:[%s2212_s12 + $0xf0] sm:$0xf0]  ;;  %v1982_v53 = vld [vmem:[%s2212_s12 + $0x144] sm:$0xf] }
  0x40   : > { %v1674_v61 = vor.u32 %v1970_v54, %v1671_v55  ;;  %v1719_v54 = vld [vmem:[%s2212_s12 + $0x150] sm:$0xf0]  ;;  %v1725_v55 = vld [vmem:[%s2212_s12 + $0x148] sm:$0xf] }
  0x4c   : > { %953 = vmatmul.bf16.gmra.mxu0 %v1590_v0  ;;  %v1685_v0 = vld [vmem:[%s2212_s12 + $0x100] sm:$0xf] }
  0x4d   : > { %1042 = vmatmul.bf16.gmra.mxu1 %v1594_v1  ;;  %v1976_v1 = vld [vmem:[%s2212_s12 + $0x10c] sm:$0xf0] }
  0x4e   : > { %1131 = vmatmul.bf16.gmra.mxu2 %v1598_v2  ;;  %v1974_v2 = vld [vmem:[%s2212_s12 + $0x104] sm:$0xf]  ;;  %v1686_v8 = vor.u32 %v1976_v1, %v1685_v0 }
  0x4f   : > { %1220 = vmatmul.bf16.gmra.mxu3 %v1602_v3  ;;  %v1687_v3 = vld [vmem:[%s2212_s12 + $0x110] sm:$0xf0] }
  0x50   : > { %v1690_v9 = vor.u32 %v1974_v2, %v1687_v3  ;;  %v1726_v3 = vor.u32 %v1985_v56, %v1725_v55 }
  0x5c   : > { %958 = vmatmul.bf16.gmra.mxu0 %v1606_v12  ;;  %v1694_v12 = vor.u32 %v1977_v5, %v1693_v4  ;;  %v1730_v4 = vor.u32 %v1983_v57, %v1727_v58 }
  0x5d   : > { %1047 = vmatmul.bf16.gmra.mxu1 %v1610_v13  ;;  %v1698_v13 = vor.u32 %v1975_v6, %v1695_v7 }
  0x5e   : > { %1136 = vmatmul.bf16.gmra.mxu2 %v1614_v14 }
  0x5f   : > { %1225 = vmatmul.bf16.gmra.mxu3 %v1618_v15 }
  0x6c   : > { %963 = vmatmul.bf16.gmra.mxu0 %v1622_v24 }
  0x6d   : > { %1052 = vmatmul.bf16.gmra.mxu1 %v1626_v25  ;;  %v1978_v25 = vld [vmem:[%s2212_s12 + $0x124] sm:$0xf] }
  0x6e   : > { %1141 = vmatmul.bf16.gmra.mxu2 %v1630_v26  ;;  %v1703_v26 = vld [vmem:[%s2212_s12 + $0x130] sm:$0xf0] }
  0x6f   : > { %1230 = vmatmul.bf16.gmra.mxu3 %v1634_v27  ;;  %v1709_v27 = vld [vmem:[%s2212_s12 + $0x128] sm:$0xf]  ;;  %v1706_v35 = vor.u32 %v1978_v25, %v1703_v26 }
  0x7c   : > { %968 = vmatmul.bf16.gmra.mxu0 %v1638_v36 }
  0x7d   : > { %1057 = vmatmul.bf16.gmra.mxu1 %v1642_v37 }
  0x7e   : > { %1146 = vmatmul.bf16.gmra.mxu2 %v1646_v38 }
  0x7f   : > { %1235 = vmatmul.bf16.gmra.mxu3 %v1650_v39  ;;  %v1710_v39 = vor.u32 %v1981_v28, %v1709_v27 }
  0x8c   : > { %973 = vmatmul.bf16.gmra.mxu0 %v1654_v48 }
  0x8d   : > { %1062 = vmatmul.bf16.gmra.mxu1 %v1658_v49 }
  0x8e   : > { %1151 = vmatmul.bf16.gmra.mxu2 %v1662_v50  ;;  %v1717_v50 = vld [vmem:[%s2212_s12 + $0x140] sm:$0xf] }
  0x8f   : > { %1240 = vmatmul.bf16.gmra.mxu3 %v1666_v51  ;;  %v1984_v51 = vld [vmem:[%s2212_s12 + $0x14c] sm:$0xf0] }
  0x9c   : > { %978 = vmatmul.bf16.gmra.mxu0 %v1670_v60 }
  0x9d   : > { %1067 = vmatmul.bf16.gmra.mxu1 %v1674_v61 }
  0x9e   : > { %1156 = vmatmul.bf16.gmra.mxu2 %v1678_v62  ;;  %v1718_v62 = vor.u32 %v1984_v51, %v1717_v50  ;;  %v1991_v50 = vld [vmem:[%s2212_s12 + $0x18c] sm:$0xf]  ;;  %v1759_v51 = vld [vmem:[%s2212_s12 + $0x198] sm:$0xf0] }
  0x9f   : > { %1245 = vmatmul.bf16.gmra.mxu3 %v1682_v63  ;;  %v1722_v63 = vor.u32 %v1982_v53, %v1719_v54 }
  0xa9   : > { %v944_v10 = vpop.f32.mrf.mxu0 }
  0xaa   : > { %v1033_v11 = vpop.f32.mrf.mxu1 }
  0xab   : > { %v1034_v14 = vadd.f32 %v1033_v11, %v944_v10 }
  0xac   : > { %983 = vmatmul.bf16.gmra.mxu0 %v1686_v8 }
  0xad   : > { %1072 = vmatmul.bf16.gmra.mxu1 %v1690_v9 }
  0xae   : > { %1161 = vmatmul.bf16.gmra.mxu2 %v1694_v12 }
  0xaf   : > { %1250 = vmatmul.bf16.gmra.mxu3 %v1698_v13 }
  0xb1   : > { %v1122_v15 = vpop.f32.mrf.mxu2  ;;  %v946_v19 = vpop.f32.mrf.mxu0 }
  0xb2   : > { %v1211_v16 = vpop.f32.mrf.mxu3  ;;  %v1123_v17 = vadd.f32 %v1122_v15, %v1034_v14  ;;  %v1035_v20 = vpop.f32.mrf.mxu1  ;;  %v1733_v14 = vld [vmem:[%s2212_s12 + $0x160] sm:$0xf]  ;;  %v1988_v15 = vld [vmem:[%s2212_s12 + $0x16c] sm:$0xf0] }
  0xb3   : > { %v1036_v31 = vadd.f32 %v1035_v20, %v946_v19  ;;  %v1735_v19 = vld [vmem:[%s2212_s12 + $0x170] sm:$0xf0]  ;;  %v1741_v20 = vld [vmem:[%s2212_s12 + $0x168] sm:$0xf]  ;;  %v1734_v27 = vor.u32 %v1988_v15, %v1733_v14  ;;  %v1995_v14 = vld [vmem:[%s2212_s12 + $0x1ac] sm:$0xf] }
  0xb4   : > { %v1212_v21 = vadd.f32 %v1211_v16, %v1123_v17  ;;  %v1986_v17 = vld [vmem:[%s2212_s12 + $0x164] sm:$0xf]  ;;  %v1775_v15 = vld [vmem:[%s2212_s12 + $0x1b8] sm:$0xf0] }
  0xb5   : > { %v1738_v28 = vor.u32 %v1986_v17, %v1735_v19 }
  0xb6   : > { %v1394_v24 = vadd.f32 %v2308_v18, %v1212_v21  ;;  %v1989_v21 = vld [vmem:[%s2212_s12 + $0x174] sm:$0xf0] }
  0xb8   : > { %1426 = vst [vmem:[%s2313_s21] sm:$0xff] %v1394_v24 }
  0xb9   : > { %v1124_v32 = vpop.f32.mrf.mxu2  ;;  %v949_v37 = vpop.f32.mrf.mxu0 }
  0xba   : > { %v1213_v33 = vpop.f32.mrf.mxu3  ;;  %v1125_v36 = vadd.f32 %v1124_v32, %v1036_v31  ;;  %v1038_v38 = vpop.f32.mrf.mxu1  ;;  %v1742_v32 = vor.u32 %v1989_v21, %v1741_v20 }
  0xbb   : > { %v1039_v43 = vadd.f32 %v1038_v38, %v949_v37 }
  0xbc   : > { %v1214_v41 = vadd.f32 %v1213_v33, %v1125_v36  ;;  %988 = vmatmul.bf16.gmra.mxu0 %v1702_v34  ;;  %v1746_v33 = vor.u32 %v1987_v22, %v1743_v23 }
  0xbd   : > { %1077 = vmatmul.bf16.gmra.mxu1 %v1706_v35 }
  0xbe   : > { %v1395_v42 = vadd.f32 %v2308_v18, %v1214_v41  ;;  %1166 = vmatmul.bf16.gmra.mxu2 %v1710_v39 }
  0xbf   : > { %1255 = vmatmul.bf16.gmra.mxu3 %v1714_v40 }
  0xc0   : > { %1427 = vst [vmem:[%s2313_s21 + $0x8] sm:$0xff] %v1395_v42 }
  0xc1   : > { %v1127_v44 = vpop.f32.mrf.mxu2  ;;  %v951_v47 = vpop.f32.mrf.mxu0 }
  0xc2   : > { %v1216_v45 = vpop.f32.mrf.mxu3  ;;  %v1128_v46 = vadd.f32 %v1127_v44, %v1039_v43  ;;  %v1040_v48 = vpop.f32.mrf.mxu1  ;;  %v1749_v43 = vld [vmem:[%s2212_s12 + $0x180] sm:$0xf]  ;;  %v1992_v44 = vld [vmem:[%s2212_s12 + $0x18c] sm:$0xf0] }
  0xc3   : > { %v1041_v59 = vadd.f32 %v1040_v48, %v951_v47  ;;  %v1751_v47 = vld [vmem:[%s2212_s12 + $0x190] sm:$0xf0]  ;;  %v1757_v48 = vld [vmem:[%s2212_s12 + $0x188] sm:$0xf]  ;;  %v1750_v55 = vor.u32 %v1992_v44, %v1749_v43  ;;  %v1999_v43 = vld [vmem:[%s2212_s12 + $0x1cc] sm:$0xf] }
  0xc4   : > { %v1217_v49 = vadd.f32 %v1216_v45, %v1128_v46  ;;  %v1990_v46 = vld [vmem:[%s2212_s12 + $0x184] sm:$0xf]  ;;  %v1791_v44 = vld [vmem:[%s2212_s12 + $0x1d8] sm:$0xf0] }
  0xc5   : > { %v1754_v56 = vor.u32 %v1990_v46, %v1751_v47 }
  0xc6   : > { %v1396_v52 = vadd.f32 %v2308_v18, %v1217_v49  ;;  %v1993_v49 = vld [vmem:[%s2212_s12 + $0x194] sm:$0xf0] }
  0xc8   : > { %1428 = vst [vmem:[%s2313_s21 + $0x10] sm:$0xff] %v1396_v52 }
  0xc9   : > { %v1129_v60 = vpop.f32.mrf.mxu2  ;;  %v954_v1 = vpop.f32.mrf.mxu0 }
  0xca   : > { %v1218_v61 = vpop.f32.mrf.mxu3  ;;  %v1130_v0 = vadd.f32 %v1129_v60, %v1041_v59  ;;  %v1043_v2 = vpop.f32.mrf.mxu1  ;;  %v1758_v60 = vor.u32 %v1993_v49, %v1757_v48 }
  0xcb   : > { %v1044_v7 = vadd.f32 %v1043_v2, %v954_v1 }
  0xcc   : > { %v1219_v5 = vadd.f32 %v1218_v61, %v1130_v0  ;;  %993 = vmatmul.bf16.gmra.mxu0 %v1718_v62  ;;  %v1762_v61 = vor.u32 %v1991_v50, %v1759_v51 }
  0xcd   : > { %1082 = vmatmul.bf16.gmra.mxu1 %v1722_v63 }
  0xce   : > { %v1397_v6 = vadd.f32 %v2308_v18, %v1219_v5  ;;  %1171 = vmatmul.bf16.gmra.mxu2 %v1726_v3 }
  0xcf   : > { %1260 = vmatmul.bf16.gmra.mxu3 %v1730_v4 }
  0xd0   : > { %1429 = vst [vmem:[%s2313_s21 + $0x18] sm:$0xff] %v1397_v6 }
  0xd1   : > { %v1132_v8 = vpop.f32.mrf.mxu2  ;;  %v956_v11 = vpop.f32.mrf.mxu0 }
  0xd2   : > { %v1221_v9 = vpop.f32.mrf.mxu3  ;;  %v1133_v10 = vadd.f32 %v1132_v8, %v1044_v7  ;;  %v1045_v12 = vpop.f32.mrf.mxu1  ;;  %v1765_v7 = vld [vmem:[%s2212_s12 + $0x1a0] sm:$0xf]  ;;  %v1996_v8 = vld [vmem:[%s2212_s12 + $0x1ac] sm:$0xf0] }
  0xd3   : > { %v1046_v24 = vadd.f32 %v1045_v12, %v956_v11  ;;  %v1767_v11 = vld [vmem:[%s2212_s12 + $0x1b0] sm:$0xf0]  ;;  %v1773_v12 = vld [vmem:[%s2212_s12 + $0x1a8] sm:$0xf]  ;;  %v1766_v20 = vor.u32 %v1996_v8, %v1765_v7  ;;  %v2003_v7 = vld [vmem:[%s2212_s12 + $0x1ec] sm:$0xf] }
  0xd4   : > { %v1222_v13 = vadd.f32 %v1221_v9, %v1133_v10  ;;  %v1994_v10 = vld [vmem:[%s2212_s12 + $0x1a4] sm:$0xf]  ;;  %v1807_v8 = vld [vmem:[%s2212_s12 + $0x1f8] sm:$0xf0] }
  0xd5   : > { %v1770_v21 = vor.u32 %v1994_v10, %v1767_v11 }
  0xd6   : > { %v1398_v16 = vadd.f32 %v2308_v18, %v1222_v13  ;;  %v1997_v13 = vld [vmem:[%s2212_s12 + $0x1b4] sm:$0xf0] }
  0xd8   : > { %1430 = vst [vmem:[%s2313_s21 + $0x20] sm:$0xff] %v1398_v16 }
  0xd9   : > { %v1134_v25 = vpop.f32.mrf.mxu2  ;;  %v959_v30 = vpop.f32.mrf.mxu0 }
  0xda   : > { %v1223_v26 = vpop.f32.mrf.mxu3  ;;  %v1135_v29 = vadd.f32 %v1134_v25, %v1046_v24  ;;  %v1048_v31 = vpop.f32.mrf.mxu1  ;;  %v1774_v25 = vor.u32 %v1997_v13, %v1773_v12 }
  0xdb   : > { %v1049_v36 = vadd.f32 %v1048_v31, %v959_v30 }
  0xdc   : > { %v1224_v34 = vadd.f32 %v1223_v26, %v1135_v29  ;;  %998 = vmatmul.bf16.gmra.mxu0 %v1734_v27  ;;  %v1778_v26 = vor.u32 %v1995_v14, %v1775_v15 }
  0xdd   : > { %1087 = vmatmul.bf16.gmra.mxu1 %v1738_v28 }
  0xde   : > { %v1399_v35 = vadd.f32 %v2308_v18, %v1224_v34  ;;  %1176 = vmatmul.bf16.gmra.mxu2 %v1742_v32 }
  0xdf   : > { %1265 = vmatmul.bf16.gmra.mxu3 %v1746_v33 }
  0xe0   : > { %1431 = vst [vmem:[%s2313_s21 + $0x28] sm:$0xff] %v1399_v35 }
  0xe1   : > { %v1137_v37 = vpop.f32.mrf.mxu2  ;;  %v961_v40 = vpop.f32.mrf.mxu0 }
  0xe2   : > { %v1226_v38 = vpop.f32.mrf.mxu3  ;;  %v1138_v39 = vadd.f32 %v1137_v37, %v1049_v36  ;;  %v1050_v41 = vpop.f32.mrf.mxu1  ;;  %v1781_v36 = vld [vmem:[%s2212_s12 + $0x1c0] sm:$0xf]  ;;  %v2000_v37 = vld [vmem:[%s2212_s12 + $0x1cc] sm:$0xf0] }
  0xe3   : > { %v1051_v52 = vadd.f32 %v1050_v41, %v961_v40  ;;  %v1783_v40 = vld [vmem:[%s2212_s12 + $0x1d0] sm:$0xf0]  ;;  %v1789_v41 = vld [vmem:[%s2212_s12 + $0x1c8] sm:$0xf]  ;;  %v1782_v48 = vor.u32 %v2000_v37, %v1781_v36 }
  0xe4   : > { %v1227_v42 = vadd.f32 %v1226_v38, %v1138_v39  ;;  %v1998_v39 = vld [vmem:[%s2212_s12 + $0x1c4] sm:$0xf] }
  0xe5   : > { %v1786_v49 = vor.u32 %v1998_v39, %v1783_v40 }
  0xe6   : > { %v1400_v45 = vadd.f32 %v2308_v18, %v1227_v42  ;;  %v2001_v42 = vld [vmem:[%s2212_s12 + $0x1d4] sm:$0xf0] }
  0xe8   : > { %1432 = vst [vmem:[%s2313_s21 + $0x30] sm:$0xff] %v1400_v45 }
  0xe9   : > { %v1139_v53 = vpop.f32.mrf.mxu2  ;;  %v964_v58 = vpop.f32.mrf.mxu0 }
  0xea   : > { %v1228_v54 = vpop.f32.mrf.mxu3  ;;  %v1140_v57 = vadd.f32 %v1139_v53, %v1051_v52  ;;  %v1053_v59 = vpop.f32.mrf.mxu1  ;;  %v1790_v53 = vor.u32 %v2001_v42, %v1789_v41 }
  0xeb   : > { %v1054_v0 = vadd.f32 %v1053_v59, %v964_v58 }
  0xec   : > { %v1229_v62 = vadd.f32 %v1228_v54, %v1140_v57  ;;  %1003 = vmatmul.bf16.gmra.mxu0 %v1750_v55  ;;  %v1794_v54 = vor.u32 %v1999_v43, %v1791_v44 }
  0xed   : > { %1092 = vmatmul.bf16.gmra.mxu1 %v1754_v56 }
  0xee   : > { %v1401_v63 = vadd.f32 %v2308_v18, %v1229_v62  ;;  %1181 = vmatmul.bf16.gmra.mxu2 %v1758_v60 }
  0xef   : > { %1270 = vmatmul.bf16.gmra.mxu3 %v1762_v61 }
  0xf0   : > { %1433 = vst [vmem:[%s2313_s21 + $0x38] sm:$0xff] %v1401_v63 }
  0xf1   : > { %v1142_v1 = vpop.f32.mrf.mxu2  ;;  %v966_v4 = vpop.f32.mrf.mxu0 }
  0xf2   : > { %v1231_v2 = vpop.f32.mrf.mxu3  ;;  %v1143_v3 = vadd.f32 %v1142_v1, %v1054_v0  ;;  %v1055_v5 = vpop.f32.mrf.mxu1  ;;  %v1797_v0 = vld [vmem:[%s2212_s12 + $0x1e0] sm:$0xf]  ;;  %v2004_v1 = vld [vmem:[%s2212_s12 + $0x1ec] sm:$0xf0] }
  0xf3   : > { %v1056_v16 = vadd.f32 %v1055_v5, %v966_v4  ;;  %v1799_v4 = vld [vmem:[%s2212_s12 + $0x1f0] sm:$0xf0]  ;;  %v1805_v5 = vld [vmem:[%s2212_s12 + $0x1e8] sm:$0xf]  ;;  %v1798_v12 = vor.u32 %v2004_v1, %v1797_v0 }
  0xf4   : > { %v1232_v6 = vadd.f32 %v1231_v2, %v1143_v3  ;;  %v2002_v3 = vld [vmem:[%s2212_s12 + $0x1e4] sm:$0xf] }
  0xf5   : > { %v1802_v13 = vor.u32 %v2002_v3, %v1799_v4 }
  0xf6   : > { %v1402_v9 = vadd.f32 %v2308_v18, %v1232_v6  ;;  %v2005_v6 = vld [vmem:[%s2212_s12 + $0x1f4] sm:$0xf0] }
  0xf8   : > { %1434 = vst [vmem:[%s2313_s21 + $0x40] sm:$0xff] %v1402_v9 }
  0xf9   : > { %v1144_v17 = vpop.f32.mrf.mxu2  ;;  %v969_v23 = vpop.f32.mrf.mxu0 }
  0xfa   : > { %v1233_v19 = vpop.f32.mrf.mxu3  ;;  %v1145_v22 = vadd.f32 %v1144_v17, %v1056_v16  ;;  %v1058_v24 = vpop.f32.mrf.mxu1  ;;  %v1806_v17 = vor.u32 %v2005_v6, %v1805_v5 }
  0xfb   : > { %v1059_v29 = vadd.f32 %v1058_v24, %v969_v23 }
  0xfc   : > { %v1234_v27 = vadd.f32 %v1233_v19, %v1145_v22  ;;  %1008 = vmatmul.bf16.gmra.mxu0 %v1766_v20  ;;  %v1810_v19 = vor.u32 %v2003_v7, %v1807_v8 }
  0xfd   : > { %1097 = vmatmul.bf16.gmra.mxu1 %v1770_v21 }
  0xfe   : > { %v1403_v28 = vadd.f32 %v2308_v18, %v1234_v27  ;;  %1186 = vmatmul.bf16.gmra.mxu2 %v1774_v25 }
  0xff   : > { %1275 = vmatmul.bf16.gmra.mxu3 %v1778_v26 }
 0x100   : > { %1435 = vst [vmem:[%s2313_s21 + $0x48] sm:$0xff] %v1403_v28 }
 0x101   : > { %v1147_v30 = vpop.f32.mrf.mxu2  ;;  %v971_v33 = vpop.f32.mrf.mxu0 }
 0x102   : > { %v1236_v31 = vpop.f32.mrf.mxu3  ;;  %v1148_v32 = vadd.f32 %v1147_v30, %v1059_v29  ;;  %v1060_v34 = vpop.f32.mrf.mxu1 }
 0x103   : > { %v1061_v45 = vadd.f32 %v1060_v34, %v971_v33 }
 0x104   : > { %v1237_v35 = vadd.f32 %v1236_v31, %v1148_v32 }
 0x106   : > { %v1404_v38 = vadd.f32 %v2308_v18, %v1237_v35 }
 0x108   : > { %1436 = vst [vmem:[%s2313_s21 + $0x50] sm:$0xff] %v1404_v38 }
 0x109   : > { %v1149_v46 = vpop.f32.mrf.mxu2  ;;  %v974_v51 = vpop.f32.mrf.mxu0 }
 0x10a   : > { %v1238_v47 = vpop.f32.mrf.mxu3  ;;  %v1150_v50 = vadd.f32 %v1149_v46, %v1061_v45  ;;  %v1063_v52 = vpop.f32.mrf.mxu1 }
 0x10b   : > { %v1064_v57 = vadd.f32 %v1063_v52, %v974_v51 }
 0x10c   : > { %v1239_v55 = vadd.f32 %v1238_v47, %v1150_v50  ;;  %1013 = vmatmul.bf16.gmra.mxu0 %v1782_v48 }
 0x10d   : > { %1102 = vmatmul.bf16.gmra.mxu1 %v1786_v49 }
 0x10e   : > { %v1405_v56 = vadd.f32 %v2308_v18, %v1239_v55  ;;  %1191 = vmatmul.bf16.gmra.mxu2 %v1790_v53 }
 0x10f   : > { %1280 = vmatmul.bf16.gmra.mxu3 %v1794_v54 }
 0x110   : > { %1437 = vst [vmem:[%s2313_s21 + $0x58] sm:$0xff] %v1405_v56 }
 0x111   : > { %v1152_v58 = vpop.f32.mrf.mxu2  ;;  %v976_v61 = vpop.f32.mrf.mxu0 }
 0x112   : > { %v1241_v59 = vpop.f32.mrf.mxu3  ;;  %v1153_v60 = vadd.f32 %v1152_v58, %v1064_v57  ;;  %v1065_v62 = vpop.f32.mrf.mxu1 }
 0x113   : > { %v1066_v9 = vadd.f32 %v1065_v62, %v976_v61 }
 0x114   : > { %v1242_v63 = vadd.f32 %v1241_v59, %v1153_v60 }
 0x116   : > { %v1406_v2 = vadd.f32 %v2308_v18, %v1242_v63 }
 0x118   : > { %1438 = vst [vmem:[%s2313_s21 + $0x60] sm:$0xff] %v1406_v2 }
 0x119   : > { %v1154_v10 = vpop.f32.mrf.mxu2  ;;  %v979_v15 = vpop.f32.mrf.mxu0 }
 0x11a   : > { %v1243_v11 = vpop.f32.mrf.mxu3  ;;  %v1155_v14 = vadd.f32 %v1154_v10, %v1066_v9  ;;  %v1068_v16 = vpop.f32.mrf.mxu1 }
 0x11b   : > { %v1069_v22 = vadd.f32 %v1068_v16, %v979_v15 }
 0x11c   : > { %v1244_v20 = vadd.f32 %v1243_v11, %v1155_v14  ;;  %1018 = vmatmul.bf16.gmra.mxu0 %v1798_v12 }
 0x11d   : > { %1107 = vmatmul.bf16.gmra.mxu1 %v1802_v13 }
 0x11e   : > { %v1407_v21 = vadd.f32 %v2308_v18, %v1244_v20  ;;  %1196 = vmatmul.bf16.gmra.mxu2 %v1806_v17 }
 0x11f   : > { %1285 = vmatmul.bf16.gmra.mxu3 %v1810_v19 }
 0x120   : > { %1439 = vst [vmem:[%s2313_s21 + $0x68] sm:$0xff] %v1407_v21 }
 0x121   : > { %v1157_v23 = vpop.f32.mrf.mxu2  ;;  %v981_v26 = vpop.f32.mrf.mxu0 }
 0x122   : > { %v1246_v24 = vpop.f32.mrf.mxu3  ;;  %v1158_v25 = vadd.f32 %v1157_v23, %v1069_v22  ;;  %v1070_v27 = vpop.f32.mrf.mxu1 }
 0x123   : > { %v1071_v30 = vadd.f32 %v1070_v27, %v981_v26 }
 0x124   : > { %v1247_v28 = vadd.f32 %v1246_v24, %v1158_v25 }
 0x126   : > { %v1408_v29 = vadd.f32 %v2308_v18, %v1247_v28 }
 0x128   : > { %1440 = vst [vmem:[%s2313_s21 + $0x70] sm:$0xff] %v1408_v29 }
 0x129   : > { %v1159_v31 = vpop.f32.mrf.mxu2  ;;  %v984_v34 = vpop.f32.mrf.mxu0 }
 0x12a   : > { %v1248_v32 = vpop.f32.mrf.mxu3  ;;  %v1160_v33 = vadd.f32 %v1159_v31, %v1071_v30  ;;  %v1073_v35 = vpop.f32.mrf.mxu1 }
 0x12b   : > { %v1074_v38 = vadd.f32 %v1073_v35, %v984_v34 }
 0x12c   : > { %v1249_v36 = vadd.f32 %v1248_v32, %v1160_v33 }
 0x12e   : > { %v1409_v37 = vadd.f32 %v2308_v18, %v1249_v36 }
 0x130   : > { %1441 = vst [vmem:[%s2313_s21 + $0x78] sm:$0xff] %v1409_v37 }
 0x131   : > { %v1162_v39 = vpop.f32.mrf.mxu2  ;;  %v986_v42 = vpop.f32.mrf.mxu0 }
 0x132   : > { %v1251_v40 = vpop.f32.mrf.mxu3  ;;  %v1163_v41 = vadd.f32 %v1162_v39, %v1074_v38  ;;  %v1075_v43 = vpop.f32.mrf.mxu1 }
 0x133   : > { %v1076_v46 = vadd.f32 %v1075_v43, %v986_v42 }
 0x134   : > { %v1252_v44 = vadd.f32 %v1251_v40, %v1163_v41 }
 0x136   : > { %v1410_v45 = vadd.f32 %v2308_v18, %v1252_v44 }
 0x138   : > { %1442 = vst [vmem:[%s2313_s21 + $0x80] sm:$0xff] %v1410_v45 }
 0x139   : > { %v1164_v47 = vpop.f32.mrf.mxu2  ;;  %v989_v50 = vpop.f32.mrf.mxu0 }
 0x13a   : > { %v1253_v48 = vpop.f32.mrf.mxu3  ;;  %v1165_v49 = vadd.f32 %v1164_v47, %v1076_v46  ;;  %v1078_v51 = vpop.f32.mrf.mxu1 }
 0x13b   : > { %v1079_v54 = vadd.f32 %v1078_v51, %v989_v50 }
 0x13c   : > { %v1254_v52 = vadd.f32 %v1253_v48, %v1165_v49 }
 0x13e   : > { %v1411_v53 = vadd.f32 %v2308_v18, %v1254_v52 }
 0x140   : > { %1443 = vst [vmem:[%s2313_s21 + $0x88] sm:$0xff] %v1411_v53 }
 0x141   : > { %v1167_v55 = vpop.f32.mrf.mxu2  ;;  %v991_v58 = vpop.f32.mrf.mxu0 }
 0x142   : > { %v1256_v56 = vpop.f32.mrf.mxu3  ;;  %v1168_v57 = vadd.f32 %v1167_v55, %v1079_v54  ;;  %v1080_v59 = vpop.f32.mrf.mxu1 }
 0x143   : > { %v1081_v62 = vadd.f32 %v1080_v59, %v991_v58 }
 0x144   : > { %v1257_v60 = vadd.f32 %v1256_v56, %v1168_v57 }
 0x146   : > { %v1412_v61 = vadd.f32 %v2308_v18, %v1257_v60 }
 0x148   : > { %1444 = vst [vmem:[%s2313_s21 + $0x90] sm:$0xff] %v1412_v61 }
 0x149   : > { %v1169_v63 = vpop.f32.mrf.mxu2  ;;  %v994_v2 = vpop.f32.mrf.mxu0 }
 0x14a   : > { %v1258_v0 = vpop.f32.mrf.mxu3  ;;  %v1170_v1 = vadd.f32 %v1169_v63, %v1081_v62  ;;  %v1083_v3 = vpop.f32.mrf.mxu1 }
 0x14b   : > { %v1084_v6 = vadd.f32 %v1083_v3, %v994_v2 }
 0x14c   : > { %v1259_v4 = vadd.f32 %v1258_v0, %v1170_v1 }
 0x14e   : > { %v1413_v5 = vadd.f32 %v2308_v18, %v1259_v4 }
 0x150   : > { %1445 = vst [vmem:[%s2313_s21 + $0x98] sm:$0xff] %v1413_v5 }
 0x151   : > { %v1172_v7 = vpop.f32.mrf.mxu2  ;;  %v996_v10 = vpop.f32.mrf.mxu0 }
 0x152   : > { %v1261_v8 = vpop.f32.mrf.mxu3  ;;  %v1173_v9 = vadd.f32 %v1172_v7, %v1084_v6  ;;  %v1085_v11 = vpop.f32.mrf.mxu1 }
 0x153   : > { %v1086_v14 = vadd.f32 %v1085_v11, %v996_v10 }
 0x154   : > { %v1262_v12 = vadd.f32 %v1261_v8, %v1173_v9 }
 0x156   : > { %v1414_v13 = vadd.f32 %v2308_v18, %v1262_v12 }
 0x158   : > { %1446 = vst [vmem:[%s2313_s21 + $0xa0] sm:$0xff] %v1414_v13 }
 0x159   : > { %v1174_v15 = vpop.f32.mrf.mxu2  ;;  %v999_v19 = vpop.f32.mrf.mxu0 }
 0x15a   : > { %v1263_v16 = vpop.f32.mrf.mxu3  ;;  %v1175_v17 = vadd.f32 %v1174_v15, %v1086_v14  ;;  %v1088_v20 = vpop.f32.mrf.mxu1 }
 0x15b   : > { %v1089_v23 = vadd.f32 %v1088_v20, %v999_v19 }
 0x15c   : > { %v1264_v21 = vadd.f32 %v1263_v16, %v1175_v17 }
 0x15e   : > { %v1415_v22 = vadd.f32 %v2308_v18, %v1264_v21 }
 0x160   : > { %1447 = vst [vmem:[%s2313_s21 + $0xa8] sm:$0xff] %v1415_v22 }
 0x161   : > { %v1177_v24 = vpop.f32.mrf.mxu2  ;;  %v1001_v27 = vpop.f32.mrf.mxu0 }
 0x162   : > { %v1266_v25 = vpop.f32.mrf.mxu3  ;;  %v1178_v26 = vadd.f32 %v1177_v24, %v1089_v23  ;;  %v1090_v28 = vpop.f32.mrf.mxu1 }
 0x163   : > { %v1091_v31 = vadd.f32 %v1090_v28, %v1001_v27 }
 0x164   : > { %v1267_v29 = vadd.f32 %v1266_v25, %v1178_v26 }
 0x166   : > { %v1416_v30 = vadd.f32 %v2308_v18, %v1267_v29 }
 0x168   : > { %1448 = vst [vmem:[%s2313_s21 + $0xb0] sm:$0xff] %v1416_v30 }
 0x169   : > { %v1179_v32 = vpop.f32.mrf.mxu2  ;;  %v1004_v35 = vpop.f32.mrf.mxu0 }
 0x16a   : > { %v1268_v33 = vpop.f32.mrf.mxu3  ;;  %v1180_v34 = vadd.f32 %v1179_v32, %v1091_v31  ;;  %v1093_v36 = vpop.f32.mrf.mxu1 }
 0x16b   : > { %v1094_v39 = vadd.f32 %v1093_v36, %v1004_v35 }
 0x16c   : > { %v1269_v37 = vadd.f32 %v1268_v33, %v1180_v34 }
 0x16e   : > { %v1417_v38 = vadd.f32 %v2308_v18, %v1269_v37 }
 0x170   : > { %1449 = vst [vmem:[%s2313_s21 + $0xb8] sm:$0xff] %v1417_v38 }
 0x171   : > { %v1182_v40 = vpop.f32.mrf.mxu2  ;;  %v1006_v43 = vpop.f32.mrf.mxu0 }
 0x172   : > { %v1271_v41 = vpop.f32.mrf.mxu3  ;;  %v1183_v42 = vadd.f32 %v1182_v40, %v1094_v39  ;;  %v1095_v44 = vpop.f32.mrf.mxu1 }
 0x173   : > { %v1096_v47 = vadd.f32 %v1095_v44, %v1006_v43 }
 0x174   : > { %v1272_v45 = vadd.f32 %v1271_v41, %v1183_v42 }
 0x176   : > { %v1418_v46 = vadd.f32 %v2308_v18, %v1272_v45 }
 0x178   : > { %1450 = vst [vmem:[%s2313_s21 + $0xc0] sm:$0xff] %v1418_v46 }
 0x179   : > { %v1184_v48 = vpop.f32.mrf.mxu2  ;;  %v1009_v51 = vpop.f32.mrf.mxu0 }
 0x17a   : > { %v1273_v49 = vpop.f32.mrf.mxu3  ;;  %v1185_v50 = vadd.f32 %v1184_v48, %v1096_v47  ;;  %v1098_v52 = vpop.f32.mrf.mxu1 }
 0x17b   : > { %v1099_v55 = vadd.f32 %v1098_v52, %v1009_v51 }
 0x17c   : > { %v1274_v53 = vadd.f32 %v1273_v49, %v1185_v50 }
 0x17e   : > { %v1419_v54 = vadd.f32 %v2308_v18, %v1274_v53 }
 0x180   : > { %1451 = vst [vmem:[%s2313_s21 + $0xc8] sm:$0xff] %v1419_v54 }
 0x181   : > { %v1187_v56 = vpop.f32.mrf.mxu2  ;;  %v1011_v59 = vpop.f32.mrf.mxu0 }
 0x182   : > { %v1276_v57 = vpop.f32.mrf.mxu3  ;;  %v1188_v58 = vadd.f32 %v1187_v56, %v1099_v55  ;;  %v1100_v60 = vpop.f32.mrf.mxu1 }
 0x183   : > { %v1101_v63 = vadd.f32 %v1100_v60, %v1011_v59 }
 0x184   : > { %v1277_v61 = vadd.f32 %v1276_v57, %v1188_v58 }
 0x186   : > { %v1420_v62 = vadd.f32 %v2308_v18, %v1277_v61 }
 0x188   : > { %1452 = vst [vmem:[%s2313_s21 + $0xd0] sm:$0xff] %v1420_v62 }
 0x189   : > { %v1189_v0 = vpop.f32.mrf.mxu2  ;;  %v1014_v3 = vpop.f32.mrf.mxu0 }
 0x18a   : > { %v1278_v1 = vpop.f32.mrf.mxu3  ;;  %v1190_v2 = vadd.f32 %v1189_v0, %v1101_v63  ;;  %v1103_v4 = vpop.f32.mrf.mxu1 }
 0x18b   : > { %v1104_v7 = vadd.f32 %v1103_v4, %v1014_v3 }
 0x18c   : > { %v1279_v5 = vadd.f32 %v1278_v1, %v1190_v2 }
 0x18e   : > { %v1421_v6 = vadd.f32 %v2308_v18, %v1279_v5 }
 0x190   : > { %1453 = vst [vmem:[%s2313_s21 + $0xd8] sm:$0xff] %v1421_v6 }
 0x191   : > { %v1192_v8 = vpop.f32.mrf.mxu2  ;;  %v1016_v11 = vpop.f32.mrf.mxu0 }
 0x192   : > { %v1281_v9 = vpop.f32.mrf.mxu3  ;;  %v1193_v10 = vadd.f32 %v1192_v8, %v1104_v7  ;;  %v1105_v12 = vpop.f32.mrf.mxu1 }
 0x193   : > { %v1106_v15 = vadd.f32 %v1105_v12, %v1016_v11 }
 0x194   : > { %v1282_v13 = vadd.f32 %v1281_v9, %v1193_v10 }
 0x196   : > { %v1422_v14 = vadd.f32 %v2308_v18, %v1282_v13 }
 0x198   : > { %1454 = vst [vmem:[%s2313_s21 + $0xe0] sm:$0xff] %v1422_v14 }
 0x199   : > { %v1194_v16 = vpop.f32.mrf.mxu2  ;;  %v1019_v20 = vpop.f32.mrf.mxu0 }
 0x19a   : > { %v1283_v17 = vpop.f32.mrf.mxu3  ;;  %v1195_v19 = vadd.f32 %v1194_v16, %v1106_v15  ;;  %v1108_v21 = vpop.f32.mrf.mxu1 }
 0x19b   : > { %v1109_v24 = vadd.f32 %v1108_v21, %v1019_v20 }
 0x19c   : > { %v1284_v22 = vadd.f32 %v1283_v17, %v1195_v19 }
 0x19e   : > { %v1423_v23 = vadd.f32 %v2308_v18, %v1284_v22 }
 0x1a0   : > { %1455 = vst [vmem:[%s2313_s21 + $0xe8] sm:$0xff] %v1423_v23 }
 0x1a1   : > { %v1197_v25 = vpop.f32.mrf.mxu2  ;;  %v1021_v29 = vpop.f32.mrf.mxu0 }
 0x1a2   : > { %v1286_v26 = vpop.f32.mrf.mxu3  ;;  %v1198_v27 = vadd.f32 %v1197_v25, %v1109_v24  ;;  %v1110_v30 = vpop.f32.mrf.mxu1 }
 0x1a3   : > { %v1111_v32 = vadd.f32 %v1110_v30, %v1021_v29 }
 0x1a4   : > { %v1287_v28 = vadd.f32 %v1286_v26, %v1198_v27 }
 0x1a6   : > { %v1424_v31 = vadd.f32 %v2308_v18, %v1287_v28 }
 0x1a8   : > { %1456 = vst [vmem:[%s2313_s21 + $0xf0] sm:$0xff] %v1424_v31 }
 0x1a9   : > { %v1199_v33 = vpop.f32.mrf.mxu2 }
 0x1aa   : > { %v1200_v34 = vadd.f32 %v1199_v33, %v1111_v32  ;;  %v1288_v35 = vpop.f32.mrf.mxu3 }
 0x1ac   : > { %v1289_v36 = vadd.f32 %v1288_v35, %v1200_v34 }
 0x1ae   : > { %v1425_v37 = vadd.f32 %v2308_v18, %v1289_v36 }
 0x1b0   : > { %1457 = vst [vmem:[%s2313_s21 + $0xf8] sm:$0xff] %v1425_v37 }
 0x1b1 PF: > { %s13_s14 = sadd.s32 1, %s2085_s14   ;;  %s2448_s12 = smov %s2081_s13 }
 0x1b2   : > { %p10_p5 = scmp.ge.s32.totalorder %s13_s14, 4   ;;  %s2449_s13 = smov %s2451_s15 }
 0x1b4   :  { %12 = sbr.rel (!%p10_p5) target bundleno = 2 (0x2), region = 73 }

// kernel: gcn_inference.7
= control target key start
LH: loop header
LB: loop body
LE: loop exit
PB: predicated region body
PF: predicated region fallthrough
CT: control target
= control target key end

     0   :  { %s2266_s12 = smov 0   ;;  %s2268_s13 = smov 0   ;;  %s2587_s0 = inlined_call_operand.vmem [shape: bf16[512,512], index: 0, kind: input, shape index: {}]   ;;  %s2588_s1 = inlined_call_operand.vmem [shape: bf16[512,128], index: 1, kind: input, shape index: {}]   ;;  %s2589_s2 = inlined_call_operand.vmem [shape: f32[1,128], index: 2, kind: input, shape index: {}]   ;;  %s2590_s3 = inlined_call_operand.vmem [shape: bf16[512,128], index: 3, kind: output, shape index: {}]  }
   0x1   :  { %s2270_s14 = smov 0  }
   0x2 LB: > { %s25_s15 = sadd.s32 1, %s2240_s13  ;;  %p1613_p0 = scmp.ge.s32.totalorder %s2244_s14, 1  ;;  %s2244_s14 = sphi %s2270_s14, %s13_s14   ;;  %s2240_s13 = sphi %s2268_s13, %s2592_s13   ;;  %s2236_s12 = sphi %s2266_s12, %s2591_s12  }
   0x3   : > { %p27_p1 = scmp.ge.s32.totalorder %s25_s15, 2  ;;  %p169_p2 = scmp.lt.s32.totalorder %s2244_s14, 3 }
   0x5   : > { %s2594_s15 = smov (%p27_p1, %s25_s15), 0  ;;  %p170_p3 = pnand %p1613_p0, %p169_p2 }
   0x6   : > { %s1614_s17 = sshll.u32 (!%p170_p3), %s2236_s12, 5 }
   0x7   : > { %173 = sbr.rel (%p170_p3) target bundleno = 437 (0x1b5), region = 32  ;;  %p205_p4 = scmp.lt.s32.totalorder (!%p170_p3), %s1614_s17, 63 }
   0xc   : > { %v2077_v0 = vld [vmem:[%s2588_s1 + $0x38] sm:$0xff]  ;;  %v2076_v4 = vld [vmem:[%s2588_s1 + $0x30] sm:$0xff]  ;;  %v2075_v8 = vld [vmem:[%s2588_s1 + $0x28] sm:$0xff]  ;;  %s2596_s17 = smov (!%p205_p4, %s1614_s17), 63 }
   0xd   : > { %v2085_v1 = vld [vmem:[%s2588_s1 + $0x78] sm:$0xff]  ;;  %935 = vmatpush.bf16.msra.mxu0 %v2077_v0  ;;  %v2084_v5 = vld [vmem:[%s2588_s1 + $0x70] sm:$0xff]  ;;  %v2083_v9 = vld [vmem:[%s2588_s1 + $0x68] sm:$0xff]  ;;  %s2005_s19 = sshll.u32 %s2596_s17, 4  ;;  %s1618_s18 = sshll.u32 %s2596_s17, 2 }
   0xe   : > { %v2093_v2 = vld [vmem:[%s2588_s1 + $0xb8] sm:$0xff]  ;;  %1024 = vmatpush.bf16.msra.mxu1 %v2085_v1  ;;  %v2092_v6 = vld [vmem:[%s2588_s1 + $0xb0] sm:$0xff]  ;;  %v2091_v10 = vld [vmem:[%s2588_s1 + $0xa8] sm:$0xff]  ;;  %s2371_s12 = scalar_lea.vmem %s2587_s0, %s2005_s19  ;;  %s2482_s21 = scalar_lea.vmem %s2590_s3, %s1618_s18 }
   0xf   : > { %v2101_v3 = vld [vmem:[%s2588_s1 + $0xf8] sm:$0xff]  ;;  %1113 = vmatpush.bf16.msra.mxu2 %v2093_v2  ;;  %v2100_v7 = vld [vmem:[%s2588_s1 + $0xf0] sm:$0xff]  ;;  %v2099_v11 = vld [vmem:[%s2588_s1 + $0xe8] sm:$0xff] }
  0x10   : > { %1202 = vmatpush.bf16.msra.mxu3 %v2101_v3  ;;  %v2074_v12 = vld [vmem:[%s2588_s1 + $0x20] sm:$0xff]  ;;  %v2073_v16 = vld [vmem:[%s2588_s1 + $0x18] sm:$0xff]  ;;  %v2072_v20 = vld [vmem:[%s2588_s1 + $0x10] sm:$0xff] }
  0x11   : > { %936 = vmatpush.bf16.msra.mxu0 %v2076_v4  ;;  %v2082_v13 = vld [vmem:[%s2588_s1 + $0x60] sm:$0xff]  ;;  %v2081_v17 = vld [vmem:[%s2588_s1 + $0x58] sm:$0xff]  ;;  %v2080_v21 = vld [vmem:[%s2588_s1 + $0x50] sm:$0xff] }
  0x12   : > { %1025 = vmatpush.bf16.msra.mxu1 %v2084_v5  ;;  %v2090_v14 = vld [vmem:[%s2588_s1 + $0xa0] sm:$0xff]  ;;  %v2089_v18 = vld [vmem:[%s2588_s1 + $0x98] sm:$0xff]  ;;  %v2088_v22 = vld [vmem:[%s2588_s1 + $0x90] sm:$0xff] }
  0x13   : > { %1114 = vmatpush.bf16.msra.mxu2 %v2092_v6  ;;  %v2098_v15 = vld [vmem:[%s2588_s1 + $0xe0] sm:$0xff]  ;;  %v2097_v19 = vld [vmem:[%s2588_s1 + $0xd8] sm:$0xff]  ;;  %v2096_v23 = vld [vmem:[%s2588_s1 + $0xd0] sm:$0xff] }
  0x14   : > { %1203 = vmatpush.bf16.msra.mxu3 %v2100_v7  ;;  %v2071_v24 = vld [vmem:[%s2588_s1 + $0x8] sm:$0xff]  ;;  %v2070_v28 = vld [vmem:[%s2588_s1] sm:$0xff]  ;;  %v2008_v33 = vld [vmem:[%s2371_s12 + $0xc] sm:$0xf0] }
  0x15   : > { %937 = vmatpush.bf16.msra.mxu0 %v2075_v8  ;;  %v2079_v25 = vld [vmem:[%s2588_s1 + $0x48] sm:$0xff]  ;;  %v2078_v29 = vld [vmem:[%s2588_s1 + $0x40] sm:$0xff]  ;;  %v1623_v35 = vld [vmem:[%s2371_s12 + $0x10] sm:$0xf0] }
  0x16   : > { %1026 = vmatpush.bf16.msra.mxu1 %v2083_v9  ;;  %v2087_v26 = vld [vmem:[%s2588_s1 + $0x88] sm:$0xff]  ;;  %v2086_v30 = vld [vmem:[%s2588_s1 + $0x80] sm:$0xff]  ;;  %v2009_v37 = vld [vmem:[%s2371_s12 + $0x14] sm:$0xf0] }
  0x17   : > { %1115 = vmatpush.bf16.msra.mxu2 %v2091_v10  ;;  %v2095_v27 = vld [vmem:[%s2588_s1 + $0xc8] sm:$0xff]  ;;  %v2094_v31 = vld [vmem:[%s2588_s1 + $0xc0] sm:$0xff]  ;;  %v1631_v39 = vld [vmem:[%s2371_s12 + $0x18] sm:$0xf0] }
  0x18   : > { %1204 = vmatpush.bf16.msra.mxu3 %v2099_v11  ;;  %v1621_v32 = vld [vmem:[%s2371_s12] sm:$0xf]  ;;  %v2006_v34 = vld [vmem:[%s2371_s12 + $0x4] sm:$0xf]  ;;  %v1629_v36 = vld [vmem:[%s2371_s12 + $0x8] sm:$0xf] }
  0x19   : > { %938 = vmatpush.bf16.msra.mxu0 %v2074_v12  ;;  %v2007_v38 = vld [vmem:[%s2371_s12 + $0xc] sm:$0xf]  ;;  %v1622_v40 = vor.u32 %v2008_v33, %v1621_v32  ;;  %v1626_v41 = vor.u32 %v2006_v34, %v1623_v35  ;;  %v1630_v42 = vor.u32 %v2009_v37, %v1629_v36  ;;  %v1637_v44 = vld [vmem:[%s2371_s12 + $0x20] sm:$0xf]  ;;  %v2012_v45 = vld [vmem:[%s2371_s12 + $0x2c] sm:$0xf0] }
  0x1a   : > { %1027 = vmatpush.bf16.msra.mxu1 %v2082_v13  ;;  %v1634_v43 = vor.u32 %v2007_v38, %v1631_v39  ;;  %v2010_v46 = vld [vmem:[%s2371_s12 + $0x24] sm:$0xf]  ;;  %v1639_v47 = vld [vmem:[%s2371_s12 + $0x30] sm:$0xf0]  ;;  %v1645_v48 = vld [vmem:[%s2371_s12 + $0x28] sm:$0xf]  ;;  %v1638_v52 = vor.u32 %v2012_v45, %v1637_v44 }
  0x1b   : > { %1116 = vmatpush.bf16.msra.mxu2 %v2090_v14  ;;  %v2013_v49 = vld [vmem:[%s2371_s12 + $0x34] sm:$0xf0]  ;;  %v2011_v50 = vld [vmem:[%s2371_s12 + $0x2c] sm:$0xf]  ;;  %v1647_v51 = vld [vmem:[%s2371_s12 + $0x38] sm:$0xf0]  ;;  %v1642_v53 = vor.u32 %v2010_v46, %v1639_v47 }
  0x1c   : > { %1205 = vmatpush.bf16.msra.mxu3 %v2098_v15  ;;  %v1646_v54 = vor.u32 %v2013_v49, %v1645_v48  ;;  %v1650_v55 = vor.u32 %v2011_v50, %v1647_v51  ;;  %v1653_v56 = vld [vmem:[%s2371_s12 + $0x40] sm:$0xf]  ;;  %v2016_v57 = vld [vmem:[%s2371_s12 + $0x4c] sm:$0xf0]  ;;  %v2014_v58 = vld [vmem:[%s2371_s12 + $0x44] sm:$0xf] }
  0x1d   : > { %939 = vmatpush.bf16.msra.mxu0 %v2073_v16  ;;  %v1655_v59 = vld [vmem:[%s2371_s12 + $0x50] sm:$0xf0]  ;;  %v1661_v60 = vld [vmem:[%s2371_s12 + $0x48] sm:$0xf]  ;;  %v2017_v61 = vld [vmem:[%s2371_s12 + $0x54] sm:$0xf0]  ;;  %v1654_v0 = vor.u32 %v2016_v57, %v1653_v56 }
  0x1e   : > { %1028 = vmatpush.bf16.msra.mxu1 %v2081_v17  ;;  %v2015_v62 = vld [vmem:[%s2371_s12 + $0x4c] sm:$0xf]  ;;  %v1663_v63 = vld [vmem:[%s2371_s12 + $0x58] sm:$0xf0]  ;;  %v1658_v1 = vor.u32 %v2014_v58, %v1655_v59  ;;  %v1662_v2 = vor.u32 %v2017_v61, %v1661_v60  ;;  %v1669_v4 = vld [vmem:[%s2371_s12 + $0x60] sm:$0xf] }
  0x1f   : > { %1117 = vmatpush.bf16.msra.mxu2 %v2089_v18  ;;  %v1666_v3 = vor.u32 %v2015_v62, %v1663_v63  ;;  %v2020_v5 = vld [vmem:[%s2371_s12 + $0x6c] sm:$0xf0]  ;;  %v2018_v6 = vld [vmem:[%s2371_s12 + $0x64] sm:$0xf]  ;;  %v1671_v7 = vld [vmem:[%s2371_s12 + $0x70] sm:$0xf0] }
  0x20   : > { %1206 = vmatpush.bf16.msra.mxu3 %v2097_v19  ;;  %v1677_v8 = vld [vmem:[%s2371_s12 + $0x68] sm:$0xf]  ;;  %v2021_v9 = vld [vmem:[%s2371_s12 + $0x74] sm:$0xf0]  ;;  %v2019_v10 = vld [vmem:[%s2371_s12 + $0x6c] sm:$0xf]  ;;  %v1670_v12 = vor.u32 %v2020_v5, %v1669_v4  ;;  %v1674_v13 = vor.u32 %v2018_v6, %v1671_v7 }
  0x21   : > { %940 = vmatpush.bf16.msra.mxu0 %v2072_v20  ;;  %v1679_v11 = vld [vmem:[%s2371_s12 + $0x78] sm:$0xf0]  ;;  %v1678_v14 = vor.u32 %v2021_v9, %v1677_v8  ;;  %v1685_v16 = vld [vmem:[%s2371_s12 + $0x80] sm:$0xf]  ;;  %v2024_v17 = vld [vmem:[%s2371_s12 + $0x8c] sm:$0xf0] }
  0x22   : > { %1029 = vmatpush.bf16.msra.mxu1 %v2080_v21  ;;  %v1682_v15 = vor.u32 %v2019_v10, %v1679_v11  ;;  %v2022_v18 = vld [vmem:[%s2371_s12 + $0x84] sm:$0xf]  ;;  %v1687_v19 = vld [vmem:[%s2371_s12 + $0x90] sm:$0xf0]  ;;  %v1693_v20 = vld [vmem:[%s2371_s12 + $0x88] sm:$0xf] }
  0x23   : > { %1118 = vmatpush.bf16.msra.mxu2 %v2088_v22  ;;  %v2025_v21 = vld [vmem:[%s2371_s12 + $0x94] sm:$0xf0]  ;;  %v2023_v22 = vld [vmem:[%s2371_s12 + $0x8c] sm:$0xf]  ;;  %v1709_v32 = vld [vmem:[%s2371_s12 + $0xa8] sm:$0xf] }
  0x24   : > { %1207 = vmatpush.bf16.msra.mxu3 %v2096_v23  ;;  %v1695_v23 = vld [vmem:[%s2371_s12 + $0x98] sm:$0xf0]  ;;  %v2029_v33 = vld [vmem:[%s2371_s12 + $0xb4] sm:$0xf0]  ;;  %v2027_v34 = vld [vmem:[%s2371_s12 + $0xac] sm:$0xf] }
  0x25   : > { %941 = vmatpush.bf16.msra.mxu0 %v2071_v24  ;;  %v1686_v24 = vor.u32 %v2024_v17, %v1685_v16  ;;  %v1711_v35 = vld [vmem:[%s2371_s12 + $0xb8] sm:$0xf0]  ;;  %v1710_v38 = vor.u32 %v2029_v33, %v1709_v32  ;;  %v1725_v44 = vld [vmem:[%s2371_s12 + $0xc8] sm:$0xf]  ;;  %v2033_v45 = vld [vmem:[%s2371_s12 + $0xd4] sm:$0xf0] }
  0x26   : > { %1030 = vmatpush.bf16.msra.mxu1 %v2079_v25  ;;  %v1690_v25 = vor.u32 %v2022_v18, %v1687_v19  ;;  %v1714_v39 = vor.u32 %v2027_v34, %v1711_v35  ;;  %v2031_v46 = vld [vmem:[%s2371_s12 + $0xcc] sm:$0xf]  ;;  %v1727_v47 = vld [vmem:[%s2371_s12 + $0xd8] sm:$0xf0]  ;;  %v1726_v50 = vor.u32 %v2033_v45, %v1725_v44  ;;  %v1741_v56 = vld [vmem:[%s2371_s12 + $0xe8] sm:$0xf] }
  0x27   : > { %1119 = vmatpush.bf16.msra.mxu2 %v2087_v26  ;;  %v1694_v26 = vor.u32 %v2025_v21, %v1693_v20  ;;  %v1730_v51 = vor.u32 %v2031_v46, %v1727_v47  ;;  %v2037_v57 = vld [vmem:[%s2371_s12 + $0xf4] sm:$0xf0]  ;;  %v2035_v58 = vld [vmem:[%s2371_s12 + $0xec] sm:$0xf]  ;;  %v1743_v59 = vld [vmem:[%s2371_s12 + $0xf8] sm:$0xf0] }
  0x28   : > { %1208 = vmatpush.bf16.msra.mxu3 %v2095_v27  ;;  %v1698_v27 = vor.u32 %v2023_v22, %v1695_v23  ;;  %v1742_v62 = vor.u32 %v2037_v57, %v1741_v56  ;;  %v1746_v63 = vor.u32 %v2035_v58, %v1743_v59  ;;  %v1757_v4 = vld [vmem:[%s2371_s12 + $0x108] sm:$0xf]  ;;  %v2041_v5 = vld [vmem:[%s2371_s12 + $0x114] sm:$0xf0]  ;;  %v2039_v6 = vld [vmem:[%s2371_s12 + $0x10c] sm:$0xf] }
  0x29   : > { %942 = vmatpush.bf16.msra.mxu0 %v2070_v28  ;;  %v1701_v28 = vld [vmem:[%s2371_s12 + $0xa0] sm:$0xf]  ;;  %v1759_v7 = vld [vmem:[%s2371_s12 + $0x118] sm:$0xf0]  ;;  %v2044_v21 = vld [vmem:[%s2371_s12 + $0x12c] sm:$0xf0] }
  0x2a   : > { %1031 = vmatpush.bf16.msra.mxu1 %v2078_v29  ;;  %v2028_v29 = vld [vmem:[%s2371_s12 + $0xac] sm:$0xf0]  ;;  %v1765_v20 = vld [vmem:[%s2371_s12 + $0x120] sm:$0xf]  ;;  %v2042_v22 = vld [vmem:[%s2371_s12 + $0x124] sm:$0xf] }
  0x2b   : > { %1120 = vmatpush.bf16.msra.mxu2 %v2086_v30  ;;  %v2026_v30 = vld [vmem:[%s2371_s12 + $0xa4] sm:$0xf]  ;;  %v1702_v36 = vor.u32 %v2028_v29, %v1701_v28  ;;  %v1767_v23 = vld [vmem:[%s2371_s12 + $0x130] sm:$0xf0]  ;;  %v2474_v29 = vld [vmem:[%s2589_s2] ss:$0 sm:$0xff]  ;;  %v1766_v33 = vor.u32 %v2044_v21, %v1765_v20 }
  0x2c   : > { %1209 = vmatpush.bf16.msra.mxu3 %v2094_v31  ;;  %943 = vmatmul.bf16.vlgmr.msra.gmra.mxu0 %v1622_v40  ;;  %v1703_v31 = vld [vmem:[%s2371_s12 + $0xb0] sm:$0xf0]  ;;  %v1717_v40 = vld [vmem:[%s2371_s12 + $0xc0] sm:$0xf]  ;;  %v1770_v34 = vor.u32 %v2042_v22, %v1767_v23  ;;  %v1789_v56 = vld [vmem:[%s2371_s12 + $0x148] sm:$0xf] }
  0x2d   : > { %1032 = vmatmul.bf16.vlgmr.msra.gmra.mxu1 %v1626_v41  ;;  %v1706_v37 = vor.u32 %v2026_v30, %v1703_v31  ;;  %v2032_v41 = vld [vmem:[%s2371_s12 + $0xcc] sm:$0xf0]  ;;  %v2049_v57 = vld [vmem:[%s2371_s12 + $0x154] sm:$0xf0]  ;;  %v2047_v58 = vld [vmem:[%s2371_s12 + $0x14c] sm:$0xf] }
  0x2e   : > { %1121 = vmatmul.bf16.vlgmr.msra.gmra.mxu2 %v1630_v42  ;;  %v2030_v42 = vld [vmem:[%s2371_s12 + $0xc4] sm:$0xf]  ;;  %v1718_v48 = vor.u32 %v2032_v41, %v1717_v40  ;;  %v1791_v59 = vld [vmem:[%s2371_s12 + $0x158] sm:$0xf0]  ;;  %v2052_v20 = vld [vmem:[%s2371_s12 + $0x16c] sm:$0xf0] }
  0x2f   : > { %1210 = vmatmul.bf16.vlgmr.msra.gmra.mxu3 %v1634_v43  ;;  %v1719_v43 = vld [vmem:[%s2371_s12 + $0xd0] sm:$0xf0]  ;;  %v2050_v21 = vld [vmem:[%s2371_s12 + $0x164] sm:$0xf]  ;;  %v1805_v23 = vld [vmem:[%s2371_s12 + $0x168] sm:$0xf] }
  0x30   : > { %v1722_v49 = vor.u32 %v2030_v42, %v1719_v43  ;;  %v1799_v22 = vld [vmem:[%s2371_s12 + $0x170] sm:$0xf0] }
  0x3c   : > { %948 = vmatmul.bf16.gmra.mxu0 %v1638_v52  ;;  %v1733_v52 = vld [vmem:[%s2371_s12 + $0xe0] sm:$0xf] }
  0x3d   : > { %1037 = vmatmul.bf16.gmra.mxu1 %v1642_v53  ;;  %v2036_v53 = vld [vmem:[%s2371_s12 + $0xec] sm:$0xf0] }
  0x3e   : > { %1126 = vmatmul.bf16.gmra.mxu2 %v1646_v54  ;;  %v2034_v54 = vld [vmem:[%s2371_s12 + $0xe4] sm:$0xf]  ;;  %v1734_v60 = vor.u32 %v2036_v53, %v1733_v52  ;;  %v1781_v52 = vld [vmem:[%s2371_s12 + $0x140] sm:$0xf]  ;;  %v2048_v53 = vld [vmem:[%s2371_s12 + $0x14c] sm:$0xf0] }
  0x3f   : > { %1215 = vmatmul.bf16.gmra.mxu3 %v1650_v55  ;;  %v1735_v55 = vld [vmem:[%s2371_s12 + $0xf0] sm:$0xf0] }
  0x40   : > { %v1738_v61 = vor.u32 %v2034_v54, %v1735_v55  ;;  %v2046_v54 = vld [vmem:[%s2371_s12 + $0x144] sm:$0xf]  ;;  %v1783_v55 = vld [vmem:[%s2371_s12 + $0x150] sm:$0xf0] }
  0x4c   : > { %953 = vmatmul.bf16.gmra.mxu0 %v1654_v0  ;;  %v1749_v0 = vld [vmem:[%s2371_s12 + $0x100] sm:$0xf] }
  0x4d   : > { %1042 = vmatmul.bf16.gmra.mxu1 %v1658_v1  ;;  %v2040_v1 = vld [vmem:[%s2371_s12 + $0x10c] sm:$0xf0] }
  0x4e   : > { %1131 = vmatmul.bf16.gmra.mxu2 %v1662_v2  ;;  %v2038_v2 = vld [vmem:[%s2371_s12 + $0x104] sm:$0xf]  ;;  %v1750_v8 = vor.u32 %v2040_v1, %v1749_v0  ;;  %v1782_v0 = vor.u32 %v2048_v53, %v1781_v52  ;;  %v1786_v1 = vor.u32 %v2046_v54, %v1783_v55  ;;  %v2056_v52 = vld [vmem:[%s2371_s12 + $0x18c] sm:$0xf0]  ;;  %v1815_v54 = vld [vmem:[%s2371_s12 + $0x190] sm:$0xf0] }
  0x4f   : > { %1220 = vmatmul.bf16.gmra.mxu3 %v1666_v3  ;;  %v1751_v3 = vld [vmem:[%s2371_s12 + $0x110] sm:$0xf0]  ;;  %v2054_v53 = vld [vmem:[%s2371_s12 + $0x184] sm:$0xf]  ;;  %v1821_v55 = vld [vmem:[%s2371_s12 + $0x188] sm:$0xf] }
  0x50   : > { %v1754_v9 = vor.u32 %v2038_v2, %v1751_v3 }
  0x5c   : > { %958 = vmatmul.bf16.gmra.mxu0 %v1670_v12  ;;  %v1758_v12 = vor.u32 %v2041_v5, %v1757_v4  ;;  %v1790_v5 = vor.u32 %v2049_v57, %v1789_v56  ;;  %v2057_v56 = vld [vmem:[%s2371_s12 + $0x194] sm:$0xf0]  ;;  %v2055_v57 = vld [vmem:[%s2371_s12 + $0x18c] sm:$0xf] }
  0x5d   : > { %1047 = vmatmul.bf16.gmra.mxu1 %v1674_v13  ;;  %v1762_v13 = vor.u32 %v2039_v6, %v1759_v7  ;;  %v1794_v6 = vor.u32 %v2047_v58, %v1791_v59  ;;  %v1823_v58 = vld [vmem:[%s2371_s12 + $0x198] sm:$0xf0] }
  0x5e   : > { %1136 = vmatmul.bf16.gmra.mxu2 %v1678_v14 }
  0x5f   : > { %1225 = vmatmul.bf16.gmra.mxu3 %v1682_v15 }
  0x6c   : > { %963 = vmatmul.bf16.gmra.mxu0 %v1686_v24  ;;  %v1773_v24 = vld [vmem:[%s2371_s12 + $0x128] sm:$0xf] }
  0x6d   : > { %1052 = vmatmul.bf16.gmra.mxu1 %v1690_v25  ;;  %v2045_v25 = vld [vmem:[%s2371_s12 + $0x134] sm:$0xf0] }
  0x6e   : > { %1141 = vmatmul.bf16.gmra.mxu2 %v1694_v26  ;;  %v2043_v26 = vld [vmem:[%s2371_s12 + $0x12c] sm:$0xf] }
  0x6f   : > { %1230 = vmatmul.bf16.gmra.mxu3 %v1698_v27  ;;  %v1775_v27 = vld [vmem:[%s2371_s12 + $0x138] sm:$0xf0] }
  0x7c   : > { %968 = vmatmul.bf16.gmra.mxu0 %v1702_v36 }
  0x7d   : > { %1057 = vmatmul.bf16.gmra.mxu1 %v1706_v37 }
  0x7e   : > { %1146 = vmatmul.bf16.gmra.mxu2 %v1710_v38  ;;  %v1774_v38 = vor.u32 %v2045_v25, %v1773_v24  ;;  %v2053_v24 = vld [vmem:[%s2371_s12 + $0x174] sm:$0xf0]  ;;  %v2051_v25 = vld [vmem:[%s2371_s12 + $0x16c] sm:$0xf] }
  0x7f   : > { %1235 = vmatmul.bf16.gmra.mxu3 %v1714_v39  ;;  %v1778_v39 = vor.u32 %v2043_v26, %v1775_v27  ;;  %v1807_v26 = vld [vmem:[%s2371_s12 + $0x178] sm:$0xf0] }
  0x8c   : > { %973 = vmatmul.bf16.gmra.mxu0 %v1718_v48 }
  0x8d   : > { %1062 = vmatmul.bf16.gmra.mxu1 %v1722_v49 }
  0x8e   : > { %1151 = vmatmul.bf16.gmra.mxu2 %v1726_v50 }
  0x8f   : > { %1240 = vmatmul.bf16.gmra.mxu3 %v1730_v51 }
  0x9c   : > { %978 = vmatmul.bf16.gmra.mxu0 %v1734_v60 }
  0x9d   : > { %1067 = vmatmul.bf16.gmra.mxu1 %v1738_v61 }
  0x9e   : > { %1156 = vmatmul.bf16.gmra.mxu2 %v1742_v62 }
  0x9f   : > { %1245 = vmatmul.bf16.gmra.mxu3 %v1746_v63 }
  0xa9   : > { %v944_v10 = vpop.f32.mrf.mxu0 }
  0xaa   : > { %v1033_v11 = vpop.f32.mrf.mxu1 }
  0xab   : > { %v1034_v14 = vadd.f32 %v1033_v11, %v944_v10 }
  0xac   : > { %983 = vmatmul.bf16.gmra.mxu0 %v1750_v8 }
  0xad   : > { %1072 = vmatmul.bf16.gmra.mxu1 %v1754_v9 }
  0xae   : > { %1161 = vmatmul.bf16.gmra.mxu2 %v1758_v12 }
  0xaf   : > { %1250 = vmatmul.bf16.gmra.mxu3 %v1762_v13 }
  0xb1   : > { %v1122_v15 = vpop.f32.mrf.mxu2  ;;  %v946_v17 = vpop.f32.mrf.mxu0 }
  0xb2   : > { %v1211_v16 = vpop.f32.mrf.mxu3  ;;  %v1035_v18 = vpop.f32.mrf.mxu1  ;;  %v1123_v19 = vadd.f32 %v1122_v15, %v1034_v14 }
  0xb3   : > { %v1036_v30 = vadd.f32 %v1035_v18, %v946_v17 }
  0xb4   : > { %v1212_v28 = vadd.f32 %v1211_v16, %v1123_v19  ;;  %v1797_v19 = vld [vmem:[%s2371_s12 + $0x160] sm:$0xf] }
  0xb6   : > { %v1394_v40 = vadd.f32 %v2474_v29, %v1212_v28 }
  0xb8   : > { %v1426_v43 = vmax.f32 %v1394_v40, 0.0 }
  0xb9   : > { %v1124_v31 = vpop.f32.mrf.mxu2  ;;  %v949_v36 = vpop.f32.mrf.mxu0 }
  0xba   : > { %v1213_v32 = vpop.f32.mrf.mxu3  ;;  %v1125_v35 = vadd.f32 %v1124_v31, %v1036_v30  ;;  %v1038_v37 = vpop.f32.mrf.mxu1 }
  0xbb   : > { %v1039_v45 = vadd.f32 %v1038_v37, %v949_v36  ;;  %v1806_v37 = vor.u32 %v2053_v24, %v1805_v23  ;;  %v2061_v23 = vld [vmem:[%s2371_s12 + $0x1b4] sm:$0xf0]  ;;  %v2059_v24 = vld [vmem:[%s2371_s12 + $0x1ac] sm:$0xf] }
  0xbc   : > { %v1214_v41 = vadd.f32 %v1213_v32, %v1125_v35  ;;  %988 = vmatmul.bf16.gmra.mxu0 %v1766_v33  ;;  %v1798_v32 = vor.u32 %v2052_v20, %v1797_v19  ;;  %v1802_v33 = vor.u32 %v2050_v21, %v1799_v22  ;;  %v2060_v19 = vld [vmem:[%s2371_s12 + $0x1ac] sm:$0xf0]  ;;  %v2058_v20 = vld [vmem:[%s2371_s12 + $0x1a4] sm:$0xf]  ;;  %v1831_v21 = vld [vmem:[%s2371_s12 + $0x1b0] sm:$0xf0] }
  0xbd   : > { %1077 = vmatmul.bf16.gmra.mxu1 %v1770_v34  ;;  %v1837_v22 = vld [vmem:[%s2371_s12 + $0x1a8] sm:$0xf] }
  0xbe   : > { %v1395_v42 = vadd.f32 %v2474_v29, %v1214_v41  ;;  %1166 = vmatmul.bf16.gmra.mxu2 %v1774_v38  ;;  %v1810_v38 = vor.u32 %v2051_v25, %v1807_v26  ;;  %v1839_v25 = vld [vmem:[%s2371_s12 + $0x1b8] sm:$0xf0] }
  0xbf   : > { %1255 = vmatmul.bf16.gmra.mxu3 %v1778_v39 }
  0xc0   : > { %v1427_v44 = vmax.f32 %v1395_v42, 0.0 }
  0xc1   : > { %v1127_v46 = vpop.f32.mrf.mxu2  ;;  %v951_v49 = vpop.f32.mrf.mxu0 }
  0xc2   : > { %v1216_v47 = vpop.f32.mrf.mxu3  ;;  %v2105_v48 = vpack.c.bf16 %v1427_v44, %v1426_v43  ;;  %v1040_v50 = vpop.f32.mrf.mxu1  ;;  %v1128_v51 = vadd.f32 %v1127_v46, %v1039_v45 }
  0xc3   : > { %v1041_v61 = vadd.f32 %v1040_v50, %v951_v49 }
  0xc4   : > { %2106 = vst [vmem:[%s2482_s21] sm:$0xff] %v2105_v48   ;;  %v1217_v60 = vadd.f32 %v1216_v47, %v1128_v51  ;;  %v1813_v51 = vld [vmem:[%s2371_s12 + $0x180] sm:$0xf] }
  0xc6   : > { %v1396_v7 = vadd.f32 %v2474_v29, %v1217_v60 }
  0xc8   : > { %v1428_v10 = vmax.f32 %v1396_v7, 0.0 }
  0xc9   : > { %v1129_v62 = vpop.f32.mrf.mxu2  ;;  %v954_v3 = vpop.f32.mrf.mxu0 }
  0xca   : > { %v1218_v63 = vpop.f32.mrf.mxu3  ;;  %v1130_v2 = vadd.f32 %v1129_v62, %v1041_v61  ;;  %v1043_v4 = vpop.f32.mrf.mxu1 }
  0xcb   : > { %v1044_v12 = vadd.f32 %v1043_v4, %v954_v3  ;;  %v1822_v4 = vor.u32 %v2057_v56, %v1821_v55  ;;  %v2065_v55 = vld [vmem:[%s2371_s12 + $0x1d4] sm:$0xf0]  ;;  %v2063_v56 = vld [vmem:[%s2371_s12 + $0x1cc] sm:$0xf] }
  0xcc   : > { %v1219_v8 = vadd.f32 %v1218_v63, %v1130_v2  ;;  %993 = vmatmul.bf16.gmra.mxu0 %v1782_v0  ;;  %v1814_v63 = vor.u32 %v2056_v52, %v1813_v51  ;;  %v1818_v0 = vor.u32 %v2054_v53, %v1815_v54  ;;  %v2064_v51 = vld [vmem:[%s2371_s12 + $0x1cc] sm:$0xf0]  ;;  %v2062_v52 = vld [vmem:[%s2371_s12 + $0x1c4] sm:$0xf]  ;;  %v1847_v53 = vld [vmem:[%s2371_s12 + $0x1d0] sm:$0xf0] }
  0xcd   : > { %1082 = vmatmul.bf16.gmra.mxu1 %v1786_v1  ;;  %v1853_v54 = vld [vmem:[%s2371_s12 + $0x1c8] sm:$0xf] }
  0xce   : > { %v1397_v9 = vadd.f32 %v2474_v29, %v1219_v8  ;;  %1171 = vmatmul.bf16.gmra.mxu2 %v1790_v5  ;;  %v1826_v5 = vor.u32 %v2055_v57, %v1823_v58  ;;  %v1855_v57 = vld [vmem:[%s2371_s12 + $0x1d8] sm:$0xf0] }
  0xcf   : > { %1260 = vmatmul.bf16.gmra.mxu3 %v1794_v6 }
  0xd0   : > { %v1429_v11 = vmax.f32 %v1397_v9, 0.0 }
  0xd1   : > { %v1132_v13 = vpop.f32.mrf.mxu2  ;;  %v956_v16 = vpop.f32.mrf.mxu0 }
  0xd2   : > { %v1221_v14 = vpop.f32.mrf.mxu3  ;;  %v2110_v15 = vpack.c.bf16 %v1429_v11, %v1428_v10  ;;  %v1045_v17 = vpop.f32.mrf.mxu1  ;;  %v1133_v18 = vadd.f32 %v1132_v13, %v1044_v12 }
  0xd3   : > { %v1046_v28 = vadd.f32 %v1045_v17, %v956_v16 }
  0xd4   : > { %2182 = vst [vmem:[%s2482_s21 + $0x8] sm:$0xff] %v2110_v15   ;;  %v1222_v27 = vadd.f32 %v1221_v14, %v1133_v18  ;;  %v1829_v18 = vld [vmem:[%s2371_s12 + $0x1a0] sm:$0xf] }
  0xd6   : > { %v1398_v39 = vadd.f32 %v2474_v29, %v1222_v27 }
  0xd8   : > { %v1430_v42 = vmax.f32 %v1398_v39, 0.0 }
  0xd9   : > { %v1134_v30 = vpop.f32.mrf.mxu2  ;;  %v959_v35 = vpop.f32.mrf.mxu0 }
  0xda   : > { %v1223_v31 = vpop.f32.mrf.mxu3  ;;  %v1135_v34 = vadd.f32 %v1134_v30, %v1046_v28  ;;  %v1048_v36 = vpop.f32.mrf.mxu1 }
  0xdb   : > { %v1049_v44 = vadd.f32 %v1048_v36, %v959_v35  ;;  %v1838_v36 = vor.u32 %v2061_v23, %v1837_v22  ;;  %v2069_v22 = vld [vmem:[%s2371_s12 + $0x1f4] sm:$0xf0]  ;;  %v2067_v23 = vld [vmem:[%s2371_s12 + $0x1ec] sm:$0xf] }
  0xdc   : > { %v1224_v40 = vadd.f32 %v1223_v31, %v1135_v34  ;;  %998 = vmatmul.bf16.gmra.mxu0 %v1798_v32  ;;  %v1830_v31 = vor.u32 %v2060_v19, %v1829_v18  ;;  %v1834_v32 = vor.u32 %v2058_v20, %v1831_v21  ;;  %v2068_v18 = vld [vmem:[%s2371_s12 + $0x1ec] sm:$0xf0]  ;;  %v2066_v19 = vld [vmem:[%s2371_s12 + $0x1e4] sm:$0xf]  ;;  %v1863_v20 = vld [vmem:[%s2371_s12 + $0x1f0] sm:$0xf0] }
  0xdd   : > { %1087 = vmatmul.bf16.gmra.mxu1 %v1802_v33  ;;  %v1869_v21 = vld [vmem:[%s2371_s12 + $0x1e8] sm:$0xf] }
  0xde   : > { %v1399_v41 = vadd.f32 %v2474_v29, %v1224_v40  ;;  %1176 = vmatmul.bf16.gmra.mxu2 %v1806_v37  ;;  %v1842_v37 = vor.u32 %v2059_v24, %v1839_v25  ;;  %v1871_v24 = vld [vmem:[%s2371_s12 + $0x1f8] sm:$0xf0] }
  0xdf   : > { %1265 = vmatmul.bf16.gmra.mxu3 %v1810_v38 }
  0xe0   : > { %v1431_v43 = vmax.f32 %v1399_v41, 0.0 }
  0xe1   : > { %v1137_v45 = vpop.f32.mrf.mxu2  ;;  %v961_v48 = vpop.f32.mrf.mxu0 }
  0xe2   : > { %v1226_v46 = vpop.f32.mrf.mxu3  ;;  %v2115_v47 = vpack.c.bf16 %v1431_v43, %v1430_v42  ;;  %v1050_v49 = vpop.f32.mrf.mxu1  ;;  %v1138_v50 = vadd.f32 %v1137_v45, %v1049_v44 }
  0xe3   : > { %v1051_v60 = vadd.f32 %v1050_v49, %v961_v48 }
  0xe4   : > { %2183 = vst [vmem:[%s2482_s21 + $0x10] sm:$0xff] %v2115_v47   ;;  %v1227_v59 = vadd.f32 %v1226_v46, %v1138_v50  ;;  %v1845_v50 = vld [vmem:[%s2371_s12 + $0x1c0] sm:$0xf] }
  0xe6   : > { %v1400_v6 = vadd.f32 %v2474_v29, %v1227_v59 }
  0xe8   : > { %v1432_v9 = vmax.f32 %v1400_v6, 0.0 }
  0xe9   : > { %v1139_v61 = vpop.f32.mrf.mxu2  ;;  %v964_v2 = vpop.f32.mrf.mxu0 }
  0xea   : > { %v1228_v62 = vpop.f32.mrf.mxu3  ;;  %v1140_v1 = vadd.f32 %v1139_v61, %v1051_v60  ;;  %v1053_v3 = vpop.f32.mrf.mxu1 }
  0xeb   : > { %v1054_v11 = vadd.f32 %v1053_v3, %v964_v2  ;;  %v1854_v3 = vor.u32 %v2065_v55, %v1853_v54 }
  0xec   : > { %v1229_v7 = vadd.f32 %v1228_v62, %v1140_v1  ;;  %1003 = vmatmul.bf16.gmra.mxu0 %v1814_v63  ;;  %v1846_v62 = vor.u32 %v2064_v51, %v1845_v50  ;;  %v1850_v63 = vor.u32 %v2062_v52, %v1847_v53 }
  0xed   : > { %1092 = vmatmul.bf16.gmra.mxu1 %v1818_v0 }
  0xee   : > { %v1401_v8 = vadd.f32 %v2474_v29, %v1229_v7  ;;  %1181 = vmatmul.bf16.gmra.mxu2 %v1822_v4  ;;  %v1858_v4 = vor.u32 %v2063_v56, %v1855_v57 }
  0xef   : > { %1270 = vmatmul.bf16.gmra.mxu3 %v1826_v5 }
  0xf0   : > { %v1433_v10 = vmax.f32 %v1401_v8, 0.0 }
  0xf1   : > { %v1142_v12 = vpop.f32.mrf.mxu2  ;;  %v966_v15 = vpop.f32.mrf.mxu0 }
  0xf2   : > { %v1231_v13 = vpop.f32.mrf.mxu3  ;;  %v2120_v14 = vpack.c.bf16 %v1433_v10, %v1432_v9  ;;  %v1055_v16 = vpop.f32.mrf.mxu1  ;;  %v1143_v17 = vadd.f32 %v1142_v12, %v1054_v11 }
  0xf3   : > { %v1056_v27 = vadd.f32 %v1055_v16, %v966_v15 }
  0xf4   : > { %2184 = vst [vmem:[%s2482_s21 + $0x18] sm:$0xff] %v2120_v14   ;;  %v1232_v26 = vadd.f32 %v1231_v13, %v1143_v17  ;;  %v1861_v17 = vld [vmem:[%s2371_s12 + $0x1e0] sm:$0xf] }
  0xf6   : > { %v1402_v38 = vadd.f32 %v2474_v29, %v1232_v26 }
  0xf8   : > { %v1434_v41 = vmax.f32 %v1402_v38, 0.0 }
  0xf9   : > { %v1144_v28 = vpop.f32.mrf.mxu2  ;;  %v969_v34 = vpop.f32.mrf.mxu0 }
  0xfa   : > { %v1233_v30 = vpop.f32.mrf.mxu3  ;;  %v1145_v33 = vadd.f32 %v1144_v28, %v1056_v27  ;;  %v1058_v35 = vpop.f32.mrf.mxu1 }
  0xfb   : > { %v1059_v43 = vadd.f32 %v1058_v35, %v969_v34  ;;  %v1870_v35 = vor.u32 %v2069_v22, %v1869_v21 }
  0xfc   : > { %v1234_v39 = vadd.f32 %v1233_v30, %v1145_v33  ;;  %1008 = vmatmul.bf16.gmra.mxu0 %v1830_v31  ;;  %v1862_v30 = vor.u32 %v2068_v18, %v1861_v17  ;;  %v1866_v31 = vor.u32 %v2066_v19, %v1863_v20 }
  0xfd   : > { %1097 = vmatmul.bf16.gmra.mxu1 %v1834_v32 }
  0xfe   : > { %v1403_v40 = vadd.f32 %v2474_v29, %v1234_v39  ;;  %1186 = vmatmul.bf16.gmra.mxu2 %v1838_v36  ;;  %v1874_v36 = vor.u32 %v2067_v23, %v1871_v24 }
  0xff   : > { %1275 = vmatmul.bf16.gmra.mxu3 %v1842_v37 }
 0x100   : > { %v1435_v42 = vmax.f32 %v1403_v40, 0.0 }
 0x101   : > { %v1147_v44 = vpop.f32.mrf.mxu2  ;;  %v971_v47 = vpop.f32.mrf.mxu0 }
 0x102   : > { %v1236_v45 = vpop.f32.mrf.mxu3  ;;  %v2125_v46 = vpack.c.bf16 %v1435_v42, %v1434_v41  ;;  %v1060_v48 = vpop.f32.mrf.mxu1  ;;  %v1148_v49 = vadd.f32 %v1147_v44, %v1059_v43 }
 0x103   : > { %v1061_v59 = vadd.f32 %v1060_v48, %v971_v47 }
 0x104   : > { %2185 = vst [vmem:[%s2482_s21 + $0x20] sm:$0xff] %v2125_v46   ;;  %v1237_v58 = vadd.f32 %v1236_v45, %v1148_v49 }
 0x106   : > { %v1404_v5 = vadd.f32 %v2474_v29, %v1237_v58 }
 0x108   : > { %v1436_v8 = vmax.f32 %v1404_v5, 0.0 }
 0x109   : > { %v1149_v60 = vpop.f32.mrf.mxu2  ;;  %v974_v1 = vpop.f32.mrf.mxu0 }
 0x10a   : > { %v1238_v61 = vpop.f32.mrf.mxu3  ;;  %v1150_v0 = vadd.f32 %v1149_v60, %v1061_v59  ;;  %v1063_v2 = vpop.f32.mrf.mxu1 }
 0x10b   : > { %v1064_v10 = vadd.f32 %v1063_v2, %v974_v1 }
 0x10c   : > { %v1239_v6 = vadd.f32 %v1238_v61, %v1150_v0  ;;  %1013 = vmatmul.bf16.gmra.mxu0 %v1846_v62 }
 0x10d   : > { %1102 = vmatmul.bf16.gmra.mxu1 %v1850_v63 }
 0x10e   : > { %v1405_v7 = vadd.f32 %v2474_v29, %v1239_v6  ;;  %1191 = vmatmul.bf16.gmra.mxu2 %v1854_v3 }
 0x10f   : > { %1280 = vmatmul.bf16.gmra.mxu3 %v1858_v4 }
 0x110   : > { %v1437_v9 = vmax.f32 %v1405_v7, 0.0 }
 0x111   : > { %v1152_v11 = vpop.f32.mrf.mxu2  ;;  %v976_v14 = vpop.f32.mrf.mxu0 }
 0x112   : > { %v1241_v12 = vpop.f32.mrf.mxu3  ;;  %v2130_v13 = vpack.c.bf16 %v1437_v9, %v1436_v8  ;;  %v1065_v15 = vpop.f32.mrf.mxu1  ;;  %v1153_v16 = vadd.f32 %v1152_v11, %v1064_v10 }
 0x113   : > { %v1066_v26 = vadd.f32 %v1065_v15, %v976_v14 }
 0x114   : > { %2186 = vst [vmem:[%s2482_s21 + $0x28] sm:$0xff] %v2130_v13   ;;  %v1242_v25 = vadd.f32 %v1241_v12, %v1153_v16 }
 0x116   : > { %v1406_v37 = vadd.f32 %v2474_v29, %v1242_v25 }
 0x118   : > { %v1438_v40 = vmax.f32 %v1406_v37, 0.0 }
 0x119   : > { %v1154_v27 = vpop.f32.mrf.mxu2  ;;  %v979_v33 = vpop.f32.mrf.mxu0 }
 0x11a   : > { %v1243_v28 = vpop.f32.mrf.mxu3  ;;  %v1155_v32 = vadd.f32 %v1154_v27, %v1066_v26  ;;  %v1068_v34 = vpop.f32.mrf.mxu1 }
 0x11b   : > { %v1069_v42 = vadd.f32 %v1068_v34, %v979_v33 }
 0x11c   : > { %v1244_v38 = vadd.f32 %v1243_v28, %v1155_v32  ;;  %1018 = vmatmul.bf16.gmra.mxu0 %v1862_v30 }
 0x11d   : > { %1107 = vmatmul.bf16.gmra.mxu1 %v1866_v31 }
 0x11e   : > { %v1407_v39 = vadd.f32 %v2474_v29, %v1244_v38  ;;  %1196 = vmatmul.bf16.gmra.mxu2 %v1870_v35 }
 0x11f   : > { %1285 = vmatmul.bf16.gmra.mxu3 %v1874_v36 }
 0x120   : > { %v1439_v41 = vmax.f32 %v1407_v39, 0.0 }
 0x121   : > { %v1157_v43 = vpop.f32.mrf.mxu2  ;;  %v981_v46 = vpop.f32.mrf.mxu0 }
 0x122   : > { %v1246_v44 = vpop.f32.mrf.mxu3  ;;  %v2135_v45 = vpack.c.bf16 %v1439_v41, %v1438_v40  ;;  %v1070_v47 = vpop.f32.mrf.mxu1  ;;  %v1158_v48 = vadd.f32 %v1157_v43, %v1069_v42 }
 0x123   : > { %v1071_v50 = vadd.f32 %v1070_v47, %v981_v46 }
 0x124   : > { %2187 = vst [vmem:[%s2482_s21 + $0x30] sm:$0xff] %v2135_v45   ;;  %v1247_v49 = vadd.f32 %v1246_v44, %v1158_v48 }
 0x126   : > { %v1408_v56 = vadd.f32 %v2474_v29, %v1247_v49 }
 0x128   : > { %v1440_v59 = vmax.f32 %v1408_v56, 0.0 }
 0x129   : > { %v1159_v51 = vpop.f32.mrf.mxu2  ;;  %v984_v54 = vpop.f32.mrf.mxu0 }
 0x12a   : > { %v1248_v52 = vpop.f32.mrf.mxu3  ;;  %v1160_v53 = vadd.f32 %v1159_v51, %v1071_v50  ;;  %v1073_v55 = vpop.f32.mrf.mxu1 }
 0x12b   : > { %v1074_v61 = vadd.f32 %v1073_v55, %v984_v54 }
 0x12c   : > { %v1249_v57 = vadd.f32 %v1248_v52, %v1160_v53 }
 0x12e   : > { %v1409_v58 = vadd.f32 %v2474_v29, %v1249_v57 }
 0x130   : > { %v1441_v60 = vmax.f32 %v1409_v58, 0.0 }
 0x131   : > { %v1162_v62 = vpop.f32.mrf.mxu2  ;;  %v986_v1 = vpop.f32.mrf.mxu0 }
 0x132   : > { %v1251_v63 = vpop.f32.mrf.mxu3  ;;  %v2140_v0 = vpack.c.bf16 %v1441_v60, %v1440_v59  ;;  %v1075_v2 = vpop.f32.mrf.mxu1  ;;  %v1163_v3 = vadd.f32 %v1162_v62, %v1074_v61 }
 0x133   : > { %v1076_v5 = vadd.f32 %v1075_v2, %v986_v1 }
 0x134   : > { %2188 = vst [vmem:[%s2482_s21 + $0x38] sm:$0xff] %v2140_v0   ;;  %v1252_v4 = vadd.f32 %v1251_v63, %v1163_v3 }
 0x136   : > { %v1410_v11 = vadd.f32 %v2474_v29, %v1252_v4 }
 0x138   : > { %v1442_v14 = vmax.f32 %v1410_v11, 0.0 }
 0x139   : > { %v1164_v6 = vpop.f32.mrf.mxu2  ;;  %v989_v9 = vpop.f32.mrf.mxu0 }
 0x13a   : > { %v1253_v7 = vpop.f32.mrf.mxu3  ;;  %v1165_v8 = vadd.f32 %v1164_v6, %v1076_v5  ;;  %v1078_v10 = vpop.f32.mrf.mxu1 }
 0x13b   : > { %v1079_v16 = vadd.f32 %v1078_v10, %v989_v9 }
 0x13c   : > { %v1254_v12 = vadd.f32 %v1253_v7, %v1165_v8 }
 0x13e   : > { %v1411_v13 = vadd.f32 %v2474_v29, %v1254_v12 }
 0x140   : > { %v1443_v15 = vmax.f32 %v1411_v13, 0.0 }
 0x141   : > { %v1167_v17 = vpop.f32.mrf.mxu2  ;;  %v991_v20 = vpop.f32.mrf.mxu0 }
 0x142   : > { %v1256_v18 = vpop.f32.mrf.mxu3  ;;  %v2145_v19 = vpack.c.bf16 %v1443_v15, %v1442_v14  ;;  %v1080_v21 = vpop.f32.mrf.mxu1  ;;  %v1168_v22 = vadd.f32 %v1167_v17, %v1079_v16 }
 0x143   : > { %v1081_v24 = vadd.f32 %v1080_v21, %v991_v20 }
 0x144   : > { %2189 = vst [vmem:[%s2482_s21 + $0x40] sm:$0xff] %v2145_v19   ;;  %v1257_v23 = vadd.f32 %v1256_v18, %v1168_v22 }
 0x146   : > { %v1412_v31 = vadd.f32 %v2474_v29, %v1257_v23 }
 0x148   : > { %v1444_v34 = vmax.f32 %v1412_v31, 0.0 }
 0x149   : > { %v1169_v25 = vpop.f32.mrf.mxu2  ;;  %v994_v28 = vpop.f32.mrf.mxu0 }
 0x14a   : > { %v1258_v26 = vpop.f32.mrf.mxu3  ;;  %v1170_v27 = vadd.f32 %v1169_v25, %v1081_v24  ;;  %v1083_v30 = vpop.f32.mrf.mxu1 }
 0x14b   : > { %v1084_v36 = vadd.f32 %v1083_v30, %v994_v28 }
 0x14c   : > { %v1259_v32 = vadd.f32 %v1258_v26, %v1170_v27 }
 0x14e   : > { %v1413_v33 = vadd.f32 %v2474_v29, %v1259_v32 }
 0x150   : > { %v1445_v35 = vmax.f32 %v1413_v33, 0.0 }
 0x151   : > { %v1172_v37 = vpop.f32.mrf.mxu2  ;;  %v996_v40 = vpop.f32.mrf.mxu0 }
 0x152   : > { %v1261_v38 = vpop.f32.mrf.mxu3  ;;  %v2150_v39 = vpack.c.bf16 %v1445_v35, %v1444_v34  ;;  %v1085_v41 = vpop.f32.mrf.mxu1  ;;  %v1173_v42 = vadd.f32 %v1172_v37, %v1084_v36 }
 0x153   : > { %v1086_v44 = vadd.f32 %v1085_v41, %v996_v40 }
 0x154   : > { %2190 = vst [vmem:[%s2482_s21 + $0x48] sm:$0xff] %v2150_v39   ;;  %v1262_v43 = vadd.f32 %v1261_v38, %v1173_v42 }
 0x156   : > { %v1414_v50 = vadd.f32 %v2474_v29, %v1262_v43 }
 0x158   : > { %v1446_v53 = vmax.f32 %v1414_v50, 0.0 }
 0x159   : > { %v1174_v45 = vpop.f32.mrf.mxu2  ;;  %v999_v48 = vpop.f32.mrf.mxu0 }
 0x15a   : > { %v1263_v46 = vpop.f32.mrf.mxu3  ;;  %v1175_v47 = vadd.f32 %v1174_v45, %v1086_v44  ;;  %v1088_v49 = vpop.f32.mrf.mxu1 }
 0x15b   : > { %v1089_v55 = vadd.f32 %v1088_v49, %v999_v48 }
 0x15c   : > { %v1264_v51 = vadd.f32 %v1263_v46, %v1175_v47 }
 0x15e   : > { %v1415_v52 = vadd.f32 %v2474_v29, %v1264_v51 }
 0x160   : > { %v1447_v54 = vmax.f32 %v1415_v52, 0.0 }
 0x161   : > { %v1177_v56 = vpop.f32.mrf.mxu2  ;;  %v1001_v59 = vpop.f32.mrf.mxu0 }
 0x162   : > { %v1266_v57 = vpop.f32.mrf.mxu3  ;;  %v2155_v58 = vpack.c.bf16 %v1447_v54, %v1446_v53  ;;  %v1090_v60 = vpop.f32.mrf.mxu1  ;;  %v1178_v61 = vadd.f32 %v1177_v56, %v1089_v55 }
 0x163   : > { %v1091_v63 = vadd.f32 %v1090_v60, %v1001_v59 }
 0x164   : > { %2191 = vst [vmem:[%s2482_s21 + $0x50] sm:$0xff] %v2155_v58   ;;  %v1267_v62 = vadd.f32 %v1266_v57, %v1178_v61 }
 0x166   : > { %v1416_v5 = vadd.f32 %v2474_v29, %v1267_v62 }
 0x168   : > { %v1448_v8 = vmax.f32 %v1416_v5, 0.0 }
 0x169   : > { %v1179_v0 = vpop.f32.mrf.mxu2  ;;  %v1004_v3 = vpop.f32.mrf.mxu0 }
 0x16a   : > { %v1268_v1 = vpop.f32.mrf.mxu3  ;;  %v1180_v2 = vadd.f32 %v1179_v0, %v1091_v63  ;;  %v1093_v4 = vpop.f32.mrf.mxu1 }
 0x16b   : > { %v1094_v10 = vadd.f32 %v1093_v4, %v1004_v3 }
 0x16c   : > { %v1269_v6 = vadd.f32 %v1268_v1, %v1180_v2 }
 0x16e   : > { %v1417_v7 = vadd.f32 %v2474_v29, %v1269_v6 }
 0x170   : > { %v1449_v9 = vmax.f32 %v1417_v7, 0.0 }
 0x171   : > { %v1182_v11 = vpop.f32.mrf.mxu2  ;;  %v1006_v14 = vpop.f32.mrf.mxu0 }
 0x172   : > { %v1271_v12 = vpop.f32.mrf.mxu3  ;;  %v2160_v13 = vpack.c.bf16 %v1449_v9, %v1448_v8  ;;  %v1095_v15 = vpop.f32.mrf.mxu1  ;;  %v1183_v16 = vadd.f32 %v1182_v11, %v1094_v10 }
 0x173   : > { %v1096_v18 = vadd.f32 %v1095_v15, %v1006_v14 }
 0x174   : > { %2192 = vst [vmem:[%s2482_s21 + $0x58] sm:$0xff] %v2160_v13   ;;  %v1272_v17 = vadd.f32 %v1271_v12, %v1183_v16 }
 0x176   : > { %v1418_v24 = vadd.f32 %v2474_v29, %v1272_v17 }
 0x178   : > { %v1450_v27 = vmax.f32 %v1418_v24, 0.0 }
 0x179   : > { %v1184_v19 = vpop.f32.mrf.mxu2  ;;  %v1009_v22 = vpop.f32.mrf.mxu0 }
 0x17a   : > { %v1273_v20 = vpop.f32.mrf.mxu3  ;;  %v1185_v21 = vadd.f32 %v1184_v19, %v1096_v18  ;;  %v1098_v23 = vpop.f32.mrf.mxu1 }
 0x17b   : > { %v1099_v30 = vadd.f32 %v1098_v23, %v1009_v22 }
 0x17c   : > { %v1274_v25 = vadd.f32 %v1273_v20, %v1185_v21 }
 0x17e   : > { %v1419_v26 = vadd.f32 %v2474_v29, %v1274_v25 }
 0x180   : > { %v1451_v28 = vmax.f32 %v1419_v26, 0.0 }
 0x181   : > { %v1187_v31 = vpop.f32.mrf.mxu2  ;;  %v1011_v34 = vpop.f32.mrf.mxu0 }
 0x182   : > { %v1276_v32 = vpop.f32.mrf.mxu3  ;;  %v2165_v33 = vpack.c.bf16 %v1451_v28, %v1450_v27  ;;  %v1100_v35 = vpop.f32.mrf.mxu1  ;;  %v1188_v36 = vadd.f32 %v1187_v31, %v1099_v30 }
 0x183   : > { %v1101_v38 = vadd.f32 %v1100_v35, %v1011_v34 }
 0x184   : > { %2193 = vst [vmem:[%s2482_s21 + $0x60] sm:$0xff] %v2165_v33   ;;  %v1277_v37 = vadd.f32 %v1276_v32, %v1188_v36 }
 0x186   : > { %v1420_v44 = vadd.f32 %v2474_v29, %v1277_v37 }
 0x188   : > { %v1452_v47 = vmax.f32 %v1420_v44, 0.0 }
 0x189   : > { %v1189_v39 = vpop.f32.mrf.mxu2  ;;  %v1014_v42 = vpop.f32.mrf.mxu0 }
 0x18a   : > { %v1278_v40 = vpop.f32.mrf.mxu3  ;;  %v1190_v41 = vadd.f32 %v1189_v39, %v1101_v38  ;;  %v1103_v43 = vpop.f32.mrf.mxu1 }
 0x18b   : > { %v1104_v49 = vadd.f32 %v1103_v43, %v1014_v42 }
 0x18c   : > { %v1279_v45 = vadd.f32 %v1278_v40, %v1190_v41 }
 0x18e   : > { %v1421_v46 = vadd.f32 %v2474_v29, %v1279_v45 }
 0x190   : > { %v1453_v48 = vmax.f32 %v1421_v46, 0.0 }
 0x191   : > { %v1192_v50 = vpop.f32.mrf.mxu2  ;;  %v1016_v53 = vpop.f32.mrf.mxu0 }
 0x192   : > { %v1281_v51 = vpop.f32.mrf.mxu3  ;;  %v2170_v52 = vpack.c.bf16 %v1453_v48, %v1452_v47  ;;  %v1105_v54 = vpop.f32.mrf.mxu1  ;;  %v1193_v55 = vadd.f32 %v1192_v50, %v1104_v49 }
 0x193   : > { %v1106_v57 = vadd.f32 %v1105_v54, %v1016_v53 }
 0x194   : > { %2194 = vst [vmem:[%s2482_s21 + $0x68] sm:$0xff] %v2170_v52   ;;  %v1282_v56 = vadd.f32 %v1281_v51, %v1193_v55 }
 0x196   : > { %v1422_v63 = vadd.f32 %v2474_v29, %v1282_v56 }
 0x198   : > { %v1454_v2 = vmax.f32 %v1422_v63, 0.0 }
 0x199   : > { %v1194_v58 = vpop.f32.mrf.mxu2  ;;  %v1019_v61 = vpop.f32.mrf.mxu0 }
 0x19a   : > { %v1283_v59 = vpop.f32.mrf.mxu3  ;;  %v1195_v60 = vadd.f32 %v1194_v58, %v1106_v57  ;;  %v1108_v62 = vpop.f32.mrf.mxu1 }
 0x19b   : > { %v1109_v4 = vadd.f32 %v1108_v62, %v1019_v61 }
 0x19c   : > { %v1284_v0 = vadd.f32 %v1283_v59, %v1195_v60 }
 0x19e   : > { %v1423_v1 = vadd.f32 %v2474_v29, %v1284_v0 }
 0x1a0   : > { %v1455_v3 = vmax.f32 %v1423_v1, 0.0 }
 0x1a1   : > { %v1197_v5 = vpop.f32.mrf.mxu2  ;;  %v1021_v9 = vpop.f32.mrf.mxu0 }
 0x1a2   : > { %v1286_v6 = vpop.f32.mrf.mxu3  ;;  %v2175_v7 = vpack.c.bf16 %v1455_v3, %v1454_v2  ;;  %v1198_v8 = vadd.f32 %v1197_v5, %v1109_v4  ;;  %v1110_v10 = vpop.f32.mrf.mxu1 }
 0x1a3   : > { %v1111_v12 = vadd.f32 %v1110_v10, %v1021_v9 }
 0x1a4   : > { %2195 = vst [vmem:[%s2482_s21 + $0x70] sm:$0xff] %v2175_v7   ;;  %v1287_v11 = vadd.f32 %v1286_v6, %v1198_v8 }
 0x1a6   : > { %v1424_v16 = vadd.f32 %v2474_v29, %v1287_v11 }
 0x1a8   : > { %v1456_v19 = vmax.f32 %v1424_v16, 0.0 }
 0x1a9   : > { %v1199_v13 = vpop.f32.mrf.mxu2 }
 0x1aa   : > { %v1200_v14 = vadd.f32 %v1199_v13, %v1111_v12  ;;  %v1288_v15 = vpop.f32.mrf.mxu3 }
 0x1ac   : > { %v1289_v17 = vadd.f32 %v1288_v15, %v1200_v14 }
 0x1ae   : > { %v1425_v18 = vadd.f32 %v2474_v29, %v1289_v17 }
 0x1b0   : > { %v1457_v20 = vmax.f32 %v1425_v18, 0.0 }
 0x1b2   : > { %v2180_v21 = vpack.c.bf16 %v1457_v20, %v1456_v19 }
 0x1b4   : > { %2196 = vst [vmem:[%s2482_s21 + $0x78] sm:$0xff] %v2180_v21  }
 0x1b5 PF: > { %s13_s14 = sadd.s32 1, %s2244_s14   ;;  %s2591_s12 = smov %s2240_s13 }
 0x1b6   : > { %p10_p5 = scmp.ge.s32.totalorder %s13_s14, 4   ;;  %s2592_s13 = smov %s2594_s15 }
 0x1b8   :  { %12 = sbr.rel (!%p10_p5) target bundleno = 2 (0x2), region = 73 }

</bundles_post_ra>
